<compile_context>
chip_gen: v7x
topology: tpu7x:2x2x1
jax: 0.10.0
libtpu: 0.0.40
codegen_flags: <defaults>
</compile_context>

<pallas_src>
import functools

import jax
import jax.numpy as jnp
from jax.experimental import pallas as pl
from jax.experimental.pallas import tpu as pltpu

EPS = 1e-5                       # PyTorch BatchNorm2d default eps
LANE = 128
_VMEM_LIMIT = 48 * 1024 * 1024   # explicit scoped-VMEM cap (< v7x 64 MiB)


def _round_up(x, m):
    return ((x + m - 1) // m) * m


def _pad2d(x, rows, cols):
    return jnp.pad(x, ((0, rows - x.shape[0]), (0, cols - x.shape[1])))


def _pad1d(x, n):
    return jnp.pad(x, (0, n - x.shape[0]))


# ---------------------------------------------------------------------------
# Pass 1: tiled conv-as-matmul (bf16 -> f32 acc) + per-tile BN partial stats
#         (optionally a fused 1x1 shortcut matmul + its partial stats)
# ---------------------------------------------------------------------------
def _matmul_stats_kernel(*refs, has_shortcut):
    if has_shortcut:
        (p_ref, w_ref, q_ref, wsc_ref,
         conv_ref, sc_ref, st_ref, stsc_ref) = refs
    else:
        p_ref, w_ref, conv_ref, st_ref = refs

    acc = jnp.dot(p_ref[...], w_ref[...], preferred_element_type=jnp.float32)
    conv_ref[...] = acc
    s = jnp.sum(acc, axis=0, keepdims=True)
    ss = jnp.sum(acc * acc, axis=0, keepdims=True)
    st_ref[...] = jnp.concatenate([s, ss], axis=0)[None]

    if has_shortcut:
        acc_sc = jnp.dot(q_ref[...], wsc_ref[...],
                         preferred_element_type=jnp.float32)
        sc_ref[...] = acc_sc
        s2 = jnp.sum(acc_sc, axis=0, keepdims=True)
        ss2 = jnp.sum(acc_sc * acc_sc, axis=0, keepdims=True)
        stsc_ref[...] = jnp.concatenate([s2, ss2], axis=0)[None]


def conv_matmul_stats(patches, w, patches_sc=None, w_sc=None, *, tm):
    """patches: (M_pad, K) bf16, w: (K, Co_pad) bf16 [+ optional shortcut]."""
    M_pad, K = patches.shape
    Co = w.shape[1]
    grid = (M_pad // tm,)
    has_sc = patches_sc is not None

    if has_sc:
        Ksc = patches_sc.shape[1]
        inputs = [patches, w, patches_sc, w_sc]
        in_specs = [
            pl.BlockSpec((tm, K), lambda i: (i, 0)),
            pl.BlockSpec((K, Co), lambda i: (0, 0)),
            pl.BlockSpec((tm, Ksc), lambda i: (i, 0)),
            pl.BlockSpec((Ksc, Co), lambda i: (0, 0)),
        ]
        out_shape = (
            jax.ShapeDtypeStruct((M_pad, Co), jnp.float32),       # raw conv
            jax.ShapeDtypeStruct((M_pad, Co), jnp.float32),       # raw shortcut
            jax.ShapeDtypeStruct((grid[0], 2, Co), jnp.float32),  # conv stats
            jax.ShapeDtypeStruct((grid[0], 2, Co), jnp.float32),  # sc   stats
        )
        out_specs = [
            pl.BlockSpec((tm, Co), lambda i: (i, 0)),
            pl.BlockSpec((tm, Co), lambda i: (i, 0)),
            pl.BlockSpec((1, 2, Co), lambda i: (i, 0, 0)),
            pl.BlockSpec((1, 2, Co), lambda i: (i, 0, 0)),
        ]
    else:
        inputs = [patches, w]
        in_specs = [
            pl.BlockSpec((tm, K), lambda i: (i, 0)),
            pl.BlockSpec((K, Co), lambda i: (0, 0)),
        ]
        out_shape = (
            jax.ShapeDtypeStruct((M_pad, Co), jnp.float32),
            jax.ShapeDtypeStruct((grid[0], 2, Co), jnp.float32),
        )
        out_specs = [
            pl.BlockSpec((tm, Co), lambda i: (i, 0)),
            pl.BlockSpec((1, 2, Co), lambda i: (i, 0, 0)),
        ]

    kernel = functools.partial(_matmul_stats_kernel, has_shortcut=has_sc)
    return pl.pallas_call(
        kernel,
        out_shape=out_shape,
        grid_spec=pltpu.PrefetchScalarGridSpec(
            num_scalar_prefetch=0,
            grid=grid,
            in_specs=in_specs,
            out_specs=out_specs,
        ),
        compiler_params=pltpu.CompilerParams(
            dimension_semantics=("parallel",),
            vmem_limit_bytes=_VMEM_LIMIT,
        ),
    )(*inputs)


# ---------------------------------------------------------------------------
# Pass 2: tiled BN apply (scale/shift) [+ fused residual scale/shift] [+ ReLU]
# ---------------------------------------------------------------------------
def _bn_apply_kernel(*refs, relu, has_res):
    if has_res:
        x_ref, a_ref, b_ref, r_ref, ar_ref, br_ref, o_ref = refs
    else:
        x_ref, a_ref, b_ref, o_ref = refs
    y = x_ref[...] * a_ref[...] + b_ref[...]
    if has_res:
        y = y + r_ref[...] * ar_ref[...] + br_ref[...]
    if relu:
        y = jnp.maximum(y, 0.0)
    o_ref[...] = y.astype(o_ref.dtype)


def bn_apply(x, a, b, residual=None, a_res=None, b_res=None, *,
             relu, out_dtype, tm):
    M_pad, Co = x.shape
    grid = (M_pad // tm,)
    has_res = residual is not None

    inputs = [x, a, b]
    in_specs = [
        pl.BlockSpec((tm, Co), lambda i: (i, 0)),
        pl.BlockSpec((1, Co), lambda i: (0, 0)),
        pl.BlockSpec((1, Co), lambda i: (0, 0)),
    ]
    if has_res:
        inputs += [residual, a_res, b_res]
        in_specs += [
            pl.BlockSpec((tm, Co), lambda i: (i, 0)),
            pl.BlockSpec((1, Co), lambda i: (0, 0)),
            pl.BlockSpec((1, Co), lambda i: (0, 0)),
        ]

    kernel = functools.partial(_bn_apply_kernel, relu=relu, has_res=has_res)
    return pl.pallas_call(
        kernel,
        out_shape=jax.ShapeDtypeStruct((M_pad, Co), out_dtype),
        grid_spec=pltpu.PrefetchScalarGridSpec(
            num_scalar_prefetch=0,
            grid=grid,
            in_specs=in_specs,
            out_specs=pl.BlockSpec((tm, Co), lambda i: (i, 0)),
        ),
        compiler_params=pltpu.CompilerParams(
            dimension_semantics=("parallel",),
            vmem_limit_bytes=_VMEM_LIMIT,
        ),
    )(*inputs)


# ---------------------------------------------------------------------------
# Tiny JAX glue: combine per-tile partial stats -> per-channel scale/shift
# ---------------------------------------------------------------------------
def _bn_scale_shift(stats, gamma, beta, count):
    s = jnp.sum(stats[:, 0, :], axis=0)
    ss = jnp.sum(stats[:, 1, :], axis=0)
    mean = s / count
    var = jnp.maximum(ss / count - mean * mean, 0.0)   # biased batch variance
    a = gamma.astype(jnp.float32) * jax.lax.rsqrt(var + EPS)
    b = beta.astype(jnp.float32) - mean * a
    return a.reshape(1, -1), b.reshape(1, -1)


# ---------------------------------------------------------------------------
# Pure-JAX glue: im2col (bf16) + weight layout transform
# ---------------------------------------------------------------------------
def _im2col_3x3(x_nhwc, stride):
    N, H, W, C = x_nhwc.shape
    xp = jnp.pad(x_nhwc, ((0, 0), (1, 1), (1, 1), (0, 0)))
    Ho = (H + 2 - 3) // stride + 1
    Wo = (W + 2 - 3) // stride + 1
    cols = []
    for dh in range(3):
        for dw in range(3):
            cols.append(xp[:, dh: dh + stride * (Ho - 1) + 1: stride,
                              dw: dw + stride * (Wo - 1) + 1: stride, :])
    patches = jnp.stack(cols, axis=3)                  # (N, Ho, Wo, 9, C)
    return patches.reshape(N * Ho * Wo, 9 * C), Ho, Wo


def _w3x3_to_mat(w_oihw):
    Co, Ci, KH, KW = w_oihw.shape
    return jnp.transpose(w_oihw, (2, 3, 1, 0)).reshape(KH * KW * Ci, Co)


# ---------------------------------------------------------------------------
# Parameter init (deterministic, mirrors the PyTorch module's shapes)
# ---------------------------------------------------------------------------
def init_resblock_params(key, inchannel, outchannel, stride):
    ks = jax.random.split(key, 9)
    p = {
        "w1": 0.2 * jax.random.normal(ks[0], (outchannel, inchannel, 3, 3), jnp.float32),
        "g1": 1.0 + 0.1 * jax.random.normal(ks[1], (outchannel,), jnp.float32),
        "b1": 0.1 * jax.random.normal(ks[2], (outchannel,), jnp.float32),
        "w2": 0.2 * jax.random.normal(ks[3], (outchannel, outchannel, 3, 3), jnp.float32),
        "g2": 1.0 + 0.1 * jax.random.normal(ks[4], (outchannel,), jnp.float32),
        "b2": 0.1 * jax.random.normal(ks[5], (outchannel,), jnp.float32),
    }
    if stride != 1 or inchannel != outchannel:
        p["wsc"] = 0.2 * jax.random.normal(ks[6], (outchannel, inchannel, 1, 1), jnp.float32)
        p["gsc"] = 1.0 + 0.1 * jax.random.normal(ks[7], (outchannel,), jnp.float32)
        p["bsc"] = 0.1 * jax.random.normal(ks[8], (outchannel,), jnp.float32)
    return p


# ---------------------------------------------------------------------------
# ResBlock forward (NCHW in, NCHW out — same semantics as the nn.Module)
# ---------------------------------------------------------------------------
def resblock_forward(x_nchw, params, stride):
    N, Ci, H, W = x_nchw.shape
    Co = params["w1"].shape[0]

    x32 = jnp.transpose(x_nchw, (0, 2, 3, 1)).astype(jnp.float32)    # NHWC
    x16 = x32.astype(jnp.bfloat16)

    # ---- conv1: 3x3, stride s, pad 1 -> BN1 -> ReLU ----------------------
    p1, Ho, Wo = _im2col_3x3(x16, stride)
    M = N * Ho * Wo
    Co_pad = _round_up(Co, LANE)
    tm = min(256, _round_up(M, 16))
    M_pad = _round_up(M, tm)

    K1_pad = _round_up(p1.shape[1], LANE)
    p1p = _pad2d(p1, M_pad, K1_pad)
    w1p = _pad2d(_w3x3_to_mat(params["w1"]).astype(jnp.bfloat16), K1_pad, Co_pad)

    conv1, st1 = conv_matmul_stats(p1p, w1p, tm=tm)
    a1, b1 = _bn_scale_shift(st1, _pad1d(params["g1"], Co_pad),
                             _pad1d(params["b1"], Co_pad), M)
    out1 = bn_apply(conv1, a1, b1, relu=True, out_dtype=jnp.bfloat16, tm=tm)
    out1_img = out1[:M, :Co].reshape(N, Ho, Wo, Co)

    # ---- conv2: 3x3, stride 1 (+ fused 1x1 projection shortcut) ----------
    p2, _, _ = _im2col_3x3(out1_img, 1)
    K2_pad = _round_up(p2.shape[1], LANE)
    p2p = _pad2d(p2, M_pad, K2_pad)
    w2p = _pad2d(_w3x3_to_mat(params["w2"]).astype(jnp.bfloat16), K2_pad, Co_pad)

    g2 = _pad1d(params["g2"], Co_pad)
    be2 = _pad1d(params["b2"], Co_pad)

    if "wsc" in params:
        xs = x16[:, ::stride, ::stride, :].reshape(M, Ci)     # 1x1 conv, stride s
        Ksc_pad = _round_up(Ci, LANE)
        xsp = _pad2d(xs, M_pad, Ksc_pad)
        wscp = _pad2d(params["wsc"].reshape(Co, Ci).T.astype(jnp.bfloat16),
                      Ksc_pad, Co_pad)
        conv2, conv_sc, st2, st_sc = conv_matmul_stats(p2p, w2p, xsp, wscp, tm=tm)
        a2, b2 = _bn_scale_shift(st2, g2, be2, M)
        asc, bsc = _bn_scale_shift(st_sc, _pad1d(params["gsc"], Co_pad),
                                   _pad1d(params["bsc"], Co_pad), M)
        out = bn_apply(conv2, a2, b2, residual=conv_sc, a_res=asc, b_res=bsc,
                       relu=True, out_dtype=jnp.float32, tm=tm)
    else:
        conv2, st2 = conv_matmul_stats(p2p, w2p, tm=tm)
        a2, b2 = _bn_scale_shift(st2, g2, be2, M)
        res = _pad2d(x32.reshape(M, Ci), M_pad, Co_pad)       # identity (Ci == Co)
        ones = jnp.ones((1, Co_pad), jnp.float32)
        zeros = jnp.zeros((1, Co_pad), jnp.float32)
        out = bn_apply(conv2, a2, b2, residual=res, a_res=ones, b_res=zeros,
                       relu=True, out_dtype=jnp.float32, tm=tm)

    out = out[:M, :Co].reshape(N, Ho, Wo, Co)
    return jnp.transpose(out, (0, 3, 1, 2))                   # back to NCHW


# ---------------------------------------------------------------------------
# Pure-JAX reference (lax.conv with bf16 operands, f32 BN) for checking
# ---------------------------------------------------------------------------
def resblock_reference(x, params, stride):
    def conv(x_, w, s, pad):
        return jax.lax.conv_general_dilated(
            x_.astype(jnp.bfloat16), w.astype(jnp.bfloat16), (s, s),
            [(pad, pad), (pad, pad)],
            dimension_numbers=("NCHW", "OIHW", "NCHW"),
            preferred_element_type=jnp.float32)

    def bn(x_, g, b):
        mean = jnp.mean(x_, axis=(0, 2, 3), keepdims=True)
        var = jnp.mean((x_ - mean) ** 2, axis=(0, 2, 3), keepdims=True)
        return (x_ - mean) * jax.lax.rsqrt(var + EPS) * g.reshape(1, -1, 1, 1) \
            + b.reshape(1, -1, 1, 1)

    out = jnp.maximum(bn(conv(x, params["w1"], stride, 1), params["g1"], params["b1"]), 0.0)
    out = bn(conv(out, params["w2"], 1, 1), params["g2"], params["b2"])
    if "wsc" in params:
        sc = bn(conv(x, params["wsc"], stride, 0), params["gsc"], params["bsc"])
    else:
        sc = x
    return jnp.maximum(out + sc, 0.0)


if __name__ == "__main__":
    key = jax.random.PRNGKey(0)
    kx, kp1, kp2 = jax.random.split(key, 3)

    x = jax.random.normal(kx, (2, 4, 16, 16), jnp.float32)   # NCHW, like PyTorch

    fwd = jax.jit(resblock_forward, static_argnums=2)

    # Case 1: downsampling block with projection shortcut (inc=4, outc=8, stride=2)
    params = init_resblock_params(kp1, 4, 8, stride=2)
    y = jax.block_until_ready(fwd(x, params, 2))
    y_ref = resblock_reference(x, params, 2)
    assert y.shape == (2, 8, 8, 8), y.shape
    assert jnp.allclose(y, y_ref, rtol=2e-2, atol=2e-2), float(jnp.abs(y - y_ref).max())

    # Case 2: identity-shortcut block (inc=outc=4, stride=1)
    params_id = init_resblock_params(kp2, 4, 4, stride=1)
    y2 = jax.block_until_ready(fwd(x, params_id, 1))
    y2_ref = resblock_reference(x, params_id, 1)
    assert y2.shape == (2, 4, 16, 16), y2.shape
    assert jnp.allclose(y2, y2_ref, rtol=2e-2, atol=2e-2), float(jnp.abs(y2 - y2_ref).max())

    print("KERNEL_OK")
</pallas_src>

<mosaic_0001>
module attributes {stable_mosaic.version = 11 : i64} {
  func.func @_bn_apply_kernel(%arg0: i32, %arg1: memref<128x128xf32, #tpu.memory_space<vmem>>, %arg2: memref<1x128xf32, #tpu.memory_space<vmem>>, %arg3: memref<1x128xf32, #tpu.memory_space<vmem>>, %arg4: memref<128x128xbf16, #tpu.memory_space<vmem>>) attributes {dimension_semantics = [#tpu.dimension_semantics<parallel>], iteration_bounds = array<i64: 1>, scalar_prefetch = 0 : i64, scratch_operands = 0 : i64, tpu.core_type = #tpu.core_type<tc>, window_params = [{transform_indices = @transform_0, window_bounds = array<i64: 128, 128>}, {pipeline_mode = #tpu.pipeline_mode<synchronous>, transform_indices = @transform_1, window_bounds = array<i64: 1, 128>}, {pipeline_mode = #tpu.pipeline_mode<synchronous>, transform_indices = @transform_2, window_bounds = array<i64: 1, 128>}, {transform_indices = @transform_3, window_bounds = array<i64: 128, 128>}]} {
    %c0 = arith.constant 0 : index
    %c0_0 = arith.constant 0 : index
    %0 = vector.load %arg1[%c0, %c0_0] : memref<128x128xf32, #tpu.memory_space<vmem>>, vector<128x128xf32>
    %c0_1 = arith.constant 0 : index
    %c0_2 = arith.constant 0 : index
    %1 = vector.load %arg2[%c0_1, %c0_2] : memref<1x128xf32, #tpu.memory_space<vmem>>, vector<1x128xf32>
    %2 = vector.broadcast %1 : vector<1x128xf32> to vector<128x128xf32>
    %3 = arith.mulf %0, %2 : vector<128x128xf32>
    %c0_3 = arith.constant 0 : index
    %c0_4 = arith.constant 0 : index
    %4 = vector.load %arg3[%c0_3, %c0_4] : memref<1x128xf32, #tpu.memory_space<vmem>>, vector<1x128xf32>
    %5 = vector.broadcast %4 : vector<1x128xf32> to vector<128x128xf32>
    %6 = arith.addf %3, %5 : vector<128x128xf32>
    %cst = arith.constant 0.000000e+00 : f32
    %7 = vector.broadcast %cst : f32 to vector<128x128xf32>
    %8 = arith.maximumf %6, %7 : vector<128x128xf32>
    %9 = arith.truncf %8 : vector<128x128xf32> to vector<128x128xbf16>
    %c0_5 = arith.constant 0 : index
    %c0_6 = arith.constant 0 : index
    %10 = vector.load %arg4[%c0_5, %c0_6] : memref<128x128xbf16, #tpu.memory_space<vmem>>, vector<128x128xbf16>
    tpu.vector_store %arg4[%c0_5, %c0_6], %9 {strides = array<i32>} : memref<128x128xbf16, #tpu.memory_space<vmem>>, vector<128x128xbf16>,
    return
  }
  func.func @transform_0(%arg0: i32) -> (i32, i32) {
    %c0_i32 = arith.constant 0 : i32
    %c0_i32_0 = arith.constant 0 : i32
    return %arg0, %c0_i32 : i32, i32
  }
  func.func @transform_1(%arg0: i32) -> (i32, i32) {
    %c0_i32 = arith.constant 0 : i32
    %c0_i32_0 = arith.constant 0 : i32
    %c0_i32_1 = arith.constant 0 : i32
    return %c0_i32, %c0_i32_0 : i32, i32
  }
  func.func @transform_2(%arg0: i32) -> (i32, i32) {
    %c0_i32 = arith.constant 0 : i32
    %c0_i32_0 = arith.constant 0 : i32
    %c0_i32_1 = arith.constant 0 : i32
    return %c0_i32, %c0_i32_0 : i32, i32
  }
  func.func @transform_3(%arg0: i32) -> (i32, i32) {
    %c0_i32 = arith.constant 0 : i32
    %c0_i32_0 = arith.constant 0 : i32
    return %arg0, %c0_i32 : i32, i32
  }
}

module attributes {stable_mosaic.version = 11 : i64} {
  func.func @_matmul_stats_kernel(%arg0: i32, %arg1: memref<128x128xbf16, #tpu.memory_space<vmem>>, %arg2: memref<128x128xbf16, #tpu.memory_space<vmem>>, %arg3: memref<128x128xf32, #tpu.memory_space<vmem>>, %arg4: memref<1x2x128xf32, #tpu.memory_space<vmem>>) attributes {dimension_semantics = [#tpu.dimension_semantics<parallel>], iteration_bounds = array<i64: 1>, scalar_prefetch = 0 : i64, scratch_operands = 0 : i64, tpu.core_type = #tpu.core_type<tc>, window_params = [{transform_indices = @transform_0, window_bounds = array<i64: 128, 128>}, {pipeline_mode = #tpu.pipeline_mode<synchronous>, transform_indices = @transform_1, window_bounds = array<i64: 128, 128>}, {transform_indices = @transform_2, window_bounds = array<i64: 128, 128>}, {transform_indices = @transform_3, window_bounds = array<i64: 1, 2, 128>}]} {
    %c0 = arith.constant 0 : index
    %c0_0 = arith.constant 0 : index
    %0 = vector.load %arg1[%c0, %c0_0] : memref<128x128xbf16, #tpu.memory_space<vmem>>, vector<128x128xbf16>
    %c0_1 = arith.constant 0 : index
    %c0_2 = arith.constant 0 : index
    %1 = vector.load %arg2[%c0_1, %c0_2] : memref<128x128xbf16, #tpu.memory_space<vmem>>, vector<128x128xbf16>
    %cst = arith.constant dense<0.000000e+00> : vector<128x128xf32>
    %2 = tpu.matmul %0, %1, %cst {dimension_numbers = #tpu.dot_dimension_numbers<[1], [0], [0], [1], [0, 0, 1, 1], [], []>} : vector<128x128xbf16>, vector<128x128xbf16>, vector<128x128xf32> -> vector<128x128xf32>
    %c0_3 = arith.constant 0 : index
    %c0_4 = arith.constant 0 : index
    %3 = vector.load %arg3[%c0_3, %c0_4] : memref<128x128xf32, #tpu.memory_space<vmem>>, vector<128x128xf32>
    tpu.vector_store %arg3[%c0_3, %c0_4], %2 {strides = array<i32>} : memref<128x128xf32, #tpu.memory_space<vmem>>, vector<128x128xf32>,
    %cst_5 = arith.constant dense<0.000000e+00> : vector<128xf32>
    %4 = vector.multi_reduction <add>, %2, %cst_5 [0] : vector<128x128xf32> to vector<128xf32>
    %5 = vector.shape_cast %4 : vector<128xf32> to vector<1x128xf32>
    %6 = arith.mulf %2, %2 : vector<128x128xf32>
    %cst_6 = arith.constant dense<0.000000e+00> : vector<128xf32>
    %7 = vector.multi_reduction <add>, %6, %cst_6 [0] : vector<128x128xf32> to vector<128xf32>
    %8 = vector.shape_cast %7 : vector<128xf32> to vector<1x128xf32>
    %9 = tpu.concatenate %5, %8 in 0 : vector<1x128xf32>, vector<1x128xf32> -> vector<2x128xf32>
    %10 = vector.shape_cast %9 : vector<2x128xf32> to vector<1x2x128xf32>
    %c0_7 = arith.constant 0 : index
    %c0_8 = arith.constant 0 : index
    %c0_9 = arith.constant 0 : index
    %11 = vector.load %arg4[%c0_7, %c0_8, %c0_9] : memref<1x2x128xf32, #tpu.memory_space<vmem>>, vector<1x2x128xf32>
    tpu.vector_store %arg4[%c0_7, %c0_8, %c0_9], %10 {strides = array<i32>} : memref<1x2x128xf32, #tpu.memory_space<vmem>>, vector<1x2x128xf32>,
    return
  }
  func.func @transform_0(%arg0: i32) -> (i32, i32) {
    %c0_i32 = arith.constant 0 : i32
    %c0_i32_0 = arith.constant 0 : i32
    return %arg0, %c0_i32 : i32, i32
  }
  func.func @transform_1(%arg0: i32) -> (i32, i32) {
    %c0_i32 = arith.constant 0 : i32
    %c0_i32_0 = arith.constant 0 : i32
    %c0_i32_1 = arith.constant 0 : i32
    return %c0_i32, %c0_i32_0 : i32, i32
  }
  func.func @transform_2(%arg0: i32) -> (i32, i32) {
    %c0_i32 = arith.constant 0 : i32
    %c0_i32_0 = arith.constant 0 : i32
    return %arg0, %c0_i32 : i32, i32
  }
  func.func @transform_3(%arg0: i32) -> (i32, i32, i32) {
    %c0_i32 = arith.constant 0 : i32
    %c0_i32_0 = arith.constant 0 : i32
    %c0_i32_1 = arith.constant 0 : i32
    return %arg0, %c0_i32, %c0_i32_0 : i32, i32, i32
  }
}

module attributes {stable_mosaic.version = 11 : i64} {
  func.func @_matmul_stats_kernel(%arg0: i32, %arg1: memref<128x128xbf16, #tpu.memory_space<vmem>>, %arg2: memref<128x128xbf16, #tpu.memory_space<vmem>>, %arg3: memref<128x128xbf16, #tpu.memory_space<vmem>>, %arg4: memref<128x128xbf16, #tpu.memory_space<vmem>>, %arg5: memref<128x128xf32, #tpu.memory_space<vmem>>, %arg6: memref<128x128xf32, #tpu.memory_space<vmem>>, %arg7: memref<1x2x128xf32, #tpu.memory_space<vmem>>, %arg8: memref<1x2x128xf32, #tpu.memory_space<vmem>>) attributes {dimension_semantics = [#tpu.dimension_semantics<parallel>], iteration_bounds = array<i64: 1>, scalar_prefetch = 0 : i64, scratch_operands = 0 : i64, tpu.core_type = #tpu.core_type<tc>, window_params = [{transform_indices = @transform_0, window_bounds = array<i64: 128, 128>}, {pipeline_mode = #tpu.pipeline_mode<synchronous>, transform_indices = @transform_1, window_bounds = array<i64: 128, 128>}, {transform_indices = @transform_2, window_bounds = array<i64: 128, 128>}, {pipeline_mode = #tpu.pipeline_mode<synchronous>, transform_indices = @transform_3, window_bounds = array<i64: 128, 128>}, {transform_indices = @transform_4, window_bounds = array<i64: 128, 128>}, {transform_indices = @transform_5, window_bounds = array<i64: 128, 128>}, {transform_indices = @transform_6, window_bounds = array<i64: 1, 2, 128>}, {transform_indices = @transform_7, window_bounds = array<i64: 1, 2, 128>}]} {
    %c0 = arith.constant 0 : index
    %c0_0 = arith.constant 0 : index
    %0 = vector.load %arg1[%c0, %c0_0] : memref<128x128xbf16, #tpu.memory_space<vmem>>, vector<128x128xbf16>
    %c0_1 = arith.constant 0 : index
    %c0_2 = arith.constant 0 : index
    %1 = vector.load %arg2[%c0_1, %c0_2] : memref<128x128xbf16, #tpu.memory_space<vmem>>, vector<128x128xbf16>
    %cst = arith.constant dense<0.000000e+00> : vector<128x128xf32>
    %2 = tpu.matmul %0, %1, %cst {dimension_numbers = #tpu.dot_dimension_numbers<[1], [0], [0], [1], [0, 0, 1, 1], [], []>} : vector<128x128xbf16>, vector<128x128xbf16>, vector<128x128xf32> -> vector<128x128xf32>
    %c0_3 = arith.constant 0 : index
    %c0_4 = arith.constant 0 : index
    %3 = vector.load %arg5[%c0_3, %c0_4] : memref<128x128xf32, #tpu.memory_space<vmem>>, vector<128x128xf32>
    tpu.vector_store %arg5[%c0_3, %c0_4], %2 {strides = array<i32>} : memref<128x128xf32, #tpu.memory_space<vmem>>, vector<128x128xf32>,
    %cst_5 = arith.constant dense<0.000000e+00> : vector<128xf32>
    %4 = vector.multi_reduction <add>, %2, %cst_5 [0] : vector<128x128xf32> to vector<128xf32>
    %5 = vector.shape_cast %4 : vector<128xf32> to vector<1x128xf32>
    %6 = arith.mulf %2, %2 : vector<128x128xf32>
    %cst_6 = arith.constant dense<0.000000e+00> : vector<128xf32>
    %7 = vector.multi_reduction <add>, %6, %cst_6 [0] : vector<128x128xf32> to vector<128xf32>
    %8 = vector.shape_cast %7 : vector<128xf32> to vector<1x128xf32>
    %9 = tpu.concatenate %5, %8 in 0 : vector<1x128xf32>, vector<1x128xf32> -> vector<2x128xf32>
    %10 = vector.shape_cast %9 : vector<2x128xf32> to vector<1x2x128xf32>
    %c0_7 = arith.constant 0 : index
    %c0_8 = arith.constant 0 : index
    %c0_9 = arith.constant 0 : index
    %11 = vector.load %arg7[%c0_7, %c0_8, %c0_9] : memref<1x2x128xf32, #tpu.memory_space<vmem>>, vector<1x2x128xf32>
    tpu.vector_store %arg7[%c0_7, %c0_8, %c0_9], %10 {strides = array<i32>} : memref<1x2x128xf32, #tpu.memory_space<vmem>>, vector<1x2x128xf32>,
    %c0_10 = arith.constant 0 : index
    %c0_11 = arith.constant 0 : index
    %12 = vector.load %arg3[%c0_10, %c0_11] : memref<128x128xbf16, #tpu.memory_space<vmem>>, vector<128x128xbf16>
    %c0_12 = arith.constant 0 : index
    %c0_13 = arith.constant 0 : index
    %13 = vector.load %arg4[%c0_12, %c0_13] : memref<128x128xbf16, #tpu.memory_space<vmem>>, vector<128x128xbf16>
    %cst_14 = arith.constant dense<0.000000e+00> : vector<128x128xf32>
    %14 = tpu.matmul %12, %13, %cst_14 {dimension_numbers = #tpu.dot_dimension_numbers<[1], [0], [0], [1], [0, 0, 1, 1], [], []>} : vector<128x128xbf16>, vector<128x128xbf16>, vector<128x128xf32> -> vector<128x128xf32>
    %c0_15 = arith.constant 0 : index
    %c0_16 = arith.constant 0 : index
    %15 = vector.load %arg6[%c0_15, %c0_16] : memref<128x128xf32, #tpu.memory_space<vmem>>, vector<128x128xf32>
    tpu.vector_store %arg6[%c0_15, %c0_16], %14 {strides = array<i32>} : memref<128x128xf32, #tpu.memory_space<vmem>>, vector<128x128xf32>,
    %cst_17 = arith.constant dense<0.000000e+00> : vector<128xf32>
    %16 = vector.multi_reduction <add>, %14, %cst_17 [0] : vector<128x128xf32> to vector<128xf32>
    %17 = vector.shape_cast %16 : vector<128xf32> to vector<1x128xf32>
    %18 = arith.mulf %14, %14 : vector<128x128xf32>
    %cst_18 = arith.constant dense<0.000000e+00> : vector<128xf32>
    %19 = vector.multi_reduction <add>, %18, %cst_18 [0] : vector<128x128xf32> to vector<128xf32>
    %20 = vector.shape_cast %19 : vector<128xf32> to vector<1x128xf32>
    %21 = tpu.concatenate %17, %20 in 0 : vector<1x128xf32>, vector<1x128xf32> -> vector<2x128xf32>
    %22 = vector.shape_cast %21 : vector<2x128xf32> to vector<1x2x128xf32>
    %c0_19 = arith.constant 0 : index
    %c0_20 = arith.constant 0 : index
    %c0_21 = arith.constant 0 : index
    %23 = vector.load %arg8[%c0_19, %c0_20, %c0_21] : memref<1x2x128xf32, #tpu.memory_space<vmem>>, vector<1x2x128xf32>
    tpu.vector_store %arg8[%c0_19, %c0_20, %c0_21], %22 {strides = array<i32>} : memref<1x2x128xf32, #tpu.memory_space<vmem>>, vector<1x2x128xf32>,
    return
  }
  func.func @transform_0(%arg0: i32) -> (i32, i32) {
    %c0_i32 = arith.constant 0 : i32
    %c0_i32_0 = arith.constant 0 : i32
    return %arg0, %c0_i32 : i32, i32
  }
  func.func @transform_1(%arg0: i32) -> (i32, i32) {
    %c0_i32 = arith.constant 0 : i32
    %c0_i32_0 = arith.constant 0 : i32
    %c0_i32_1 = arith.constant 0 : i32
    return %c0_i32, %c0_i32_0 : i32, i32
  }
  func.func @transform_2(%arg0: i32) -> (i32, i32) {
    %c0_i32 = arith.constant 0 : i32
    %c0_i32_0 = arith.constant 0 : i32
    return %arg0, %c0_i32 : i32, i32
  }
  func.func @transform_3(%arg0: i32) -> (i32, i32) {
    %c0_i32 = arith.constant 0 : i32
    %c0_i32_0 = arith.constant 0 : i32
    %c0_i32_1 = arith.constant 0 : i32
    return %c0_i32, %c0_i32_0 : i32, i32
  }
  func.func @transform_4(%arg0: i32) -> (i32, i32) {
    %c0_i32 = arith.constant 0 : i32
    %c0_i32_0 = arith.constant 0 : i32
    return %arg0, %c0_i32 : i32, i32
  }
  func.func @transform_5(%arg0: i32) -> (i32, i32) {
    %c0_i32 = arith.constant 0 : i32
    %c0_i32_0 = arith.constant 0 : i32
    return %arg0, %c0_i32 : i32, i32
  }
  func.func @transform_6(%arg0: i32) -> (i32, i32, i32) {
    %c0_i32 = arith.constant 0 : i32
    %c0_i32_0 = arith.constant 0 : i32
    %c0_i32_1 = arith.constant 0 : i32
    return %arg0, %c0_i32, %c0_i32_0 : i32, i32, i32
  }
  func.func @transform_7(%arg0: i32) -> (i32, i32, i32) {
    %c0_i32 = arith.constant 0 : i32
    %c0_i32_0 = arith.constant 0 : i32
    %c0_i32_1 = arith.constant 0 : i32
    return %arg0, %c0_i32, %c0_i32_0 : i32, i32, i32
  }
}

module attributes {stable_mosaic.version = 11 : i64} {
  func.func @_bn_apply_kernel(%arg0: i32, %arg1: memref<128x128xf32, #tpu.memory_space<vmem>>, %arg2: memref<1x128xf32, #tpu.memory_space<vmem>>, %arg3: memref<1x128xf32, #tpu.memory_space<vmem>>, %arg4: memref<128x128xf32, #tpu.memory_space<vmem>>, %arg5: memref<1x128xf32, #tpu.memory_space<vmem>>, %arg6: memref<1x128xf32, #tpu.memory_space<vmem>>, %arg7: memref<128x128xf32, #tpu.memory_space<vmem>>) attributes {dimension_semantics = [#tpu.dimension_semantics<parallel>], iteration_bounds = array<i64: 1>, scalar_prefetch = 0 : i64, scratch_operands = 0 : i64, tpu.core_type = #tpu.core_type<tc>, window_params = [{transform_indices = @transform_0, window_bounds = array<i64: 128, 128>}, {pipeline_mode = #tpu.pipeline_mode<synchronous>, transform_indices = @transform_1, window_bounds = array<i64: 1, 128>}, {pipeline_mode = #tpu.pipeline_mode<synchronous>, transform_indices = @transform_2, window_bounds = array<i64: 1, 128>}, {transform_indices = @transform_3, window_bounds = array<i64: 128, 128>}, {pipeline_mode = #tpu.pipeline_mode<synchronous>, transform_indices = @transform_4, window_bounds = array<i64: 1, 128>}, {pipeline_mode = #tpu.pipeline_mode<synchronous>, transform_indices = @transform_5, window_bounds = array<i64: 1, 128>}, {transform_indices = @transform_6, window_bounds = array<i64: 128, 128>}]} {
    %c0 = arith.constant 0 : index
    %c0_0 = arith.constant 0 : index
    %0 = vector.load %arg1[%c0, %c0_0] : memref<128x128xf32, #tpu.memory_space<vmem>>, vector<128x128xf32>
    %c0_1 = arith.constant 0 : index
    %c0_2 = arith.constant 0 : index
    %1 = vector.load %arg2[%c0_1, %c0_2] : memref<1x128xf32, #tpu.memory_space<vmem>>, vector<1x128xf32>
    %2 = vector.broadcast %1 : vector<1x128xf32> to vector<128x128xf32>
    %3 = arith.mulf %0, %2 : vector<128x128xf32>
    %c0_3 = arith.constant 0 : index
    %c0_4 = arith.constant 0 : index
    %4 = vector.load %arg3[%c0_3, %c0_4] : memref<1x128xf32, #tpu.memory_space<vmem>>, vector<1x128xf32>
    %5 = vector.broadcast %4 : vector<1x128xf32> to vector<128x128xf32>
    %6 = arith.addf %3, %5 : vector<128x128xf32>
    %c0_5 = arith.constant 0 : index
    %c0_6 = arith.constant 0 : index
    %7 = vector.load %arg4[%c0_5, %c0_6] : memref<128x128xf32, #tpu.memory_space<vmem>>, vector<128x128xf32>
    %c0_7 = arith.constant 0 : index
    %c0_8 = arith.constant 0 : index
    %8 = vector.load %arg5[%c0_7, %c0_8] : memref<1x128xf32, #tpu.memory_space<vmem>>, vector<1x128xf32>
    %9 = vector.broadcast %8 : vector<1x128xf32> to vector<128x128xf32>
    %10 = arith.mulf %7, %9 : vector<128x128xf32>
    %11 = arith.addf %6, %10 : vector<128x128xf32>
    %c0_9 = arith.constant 0 : index
    %c0_10 = arith.constant 0 : index
    %12 = vector.load %arg6[%c0_9, %c0_10] : memref<1x128xf32, #tpu.memory_space<vmem>>, vector<1x128xf32>
    %13 = vector.broadcast %12 : vector<1x128xf32> to vector<128x128xf32>
    %14 = arith.addf %11, %13 : vector<128x128xf32>
    %cst = arith.constant 0.000000e+00 : f32
    %15 = vector.broadcast %cst : f32 to vector<128x128xf32>
    %16 = arith.maximumf %14, %15 : vector<128x128xf32>
    %c0_11 = arith.constant 0 : index
    %c0_12 = arith.constant 0 : index
    %17 = vector.load %arg7[%c0_11, %c0_12] : memref<128x128xf32, #tpu.memory_space<vmem>>, vector<128x128xf32>
    tpu.vector_store %arg7[%c0_11, %c0_12], %16 {strides = array<i32>} : memref<128x128xf32, #tpu.memory_space<vmem>>, vector<128x128xf32>,
    return
  }
  func.func @transform_0(%arg0: i32) -> (i32, i32) {
    %c0_i32 = arith.constant 0 : i32
    %c0_i32_0 = arith.constant 0 : i32
    return %arg0, %c0_i32 : i32, i32
  }
  func.func @transform_1(%arg0: i32) -> (i32, i32) {
    %c0_i32 = arith.constant 0 : i32
    %c0_i32_0 = arith.constant 0 : i32
    %c0_i32_1 = arith.constant 0 : i32
    return %c0_i32, %c0_i32_0 : i32, i32
  }
  func.func @transform_2(%arg0: i32) -> (i32, i32) {
    %c0_i32 = arith.constant 0 : i32
    %c0_i32_0 = arith.constant 0 : i32
    %c0_i32_1 = arith.constant 0 : i32
    return %c0_i32, %c0_i32_0 : i32, i32
  }
  func.func @transform_3(%arg0: i32) -> (i32, i32) {
    %c0_i32 = arith.constant 0 : i32
    %c0_i32_0 = arith.constant 0 : i32
    return %arg0, %c0_i32 : i32, i32
  }
  func.func @transform_4(%arg0: i32) -> (i32, i32) {
    %c0_i32 = arith.constant 0 : i32
    %c0_i32_0 = arith.constant 0 : i32
    %c0_i32_1 = arith.constant 0 : i32
    return %c0_i32, %c0_i32_0 : i32, i32
  }
  func.func @transform_5(%arg0: i32) -> (i32, i32) {
    %c0_i32 = arith.constant 0 : i32
    %c0_i32_0 = arith.constant 0 : i32
    %c0_i32_1 = arith.constant 0 : i32
    return %c0_i32, %c0_i32_0 : i32, i32
  }
  func.func @transform_6(%arg0: i32) -> (i32, i32) {
    %c0_i32 = arith.constant 0 : i32
    %c0_i32_0 = arith.constant 0 : i32
    return %arg0, %c0_i32 : i32, i32
  }
}

</mosaic_0001>

<bundles_post_ra>
// kernel: resblock_forward.5
= control target key start
LH: loop header
LB: loop body
LE: loop exit
PB: predicated region body
PF: predicated region fallthrough
CT: control target
= control target key end

     0   :  { %s391_s0 = inlined_call_operand.vmem [shape: f32[128,128], index: 0, kind: input, shape index: {}]   ;;  %s392_s1 = inlined_call_operand.vmem [shape: f32[1,128], index: 1, kind: input, shape index: {}]   ;;  %s393_s2 = inlined_call_operand.vmem [shape: f32[1,128], index: 2, kind: input, shape index: {}]   ;;  %s394_s3 = inlined_call_operand.vmem [shape: bf16[128,128], index: 3, kind: output, shape index: {}]  }
   0x1   :  { %v14_v0 = vld [vmem:[%s391_s0] sm:$0xff]  ;;  %v15_v1 = vld [vmem:[%s391_s0 + $0x8] sm:$0xff]  ;;  %v16_v6 = vld [vmem:[%s391_s0 + $0x10] sm:$0xff] }
   0x2   :  { %v286_v2 = vld [vmem:[%s392_s1] ss:$0 sm:$0xff]  ;;  %v17_v7 = vld [vmem:[%s391_s0 + $0x18] sm:$0xff]  ;;  %v19_v11 = vld [vmem:[%s391_s0 + $0x28] sm:$0xff] }
   0x3   :  { %v37_v3 = vmul.f32 %v286_v2, %v14_v0  ;;  %v38_v4 = vmul.f32 %v286_v2, %v15_v1  ;;  %v293_v5 = vld [vmem:[%s393_s2] ss:$0 sm:$0xff]  ;;  %v39_v8 = vmul.f32 %v286_v2, %v16_v6  ;;  %v40_v9 = vmul.f32 %v286_v2, %v17_v7  ;;  %v20_v12 = vld [vmem:[%s391_s0 + $0x30] sm:$0xff]  ;;  %v21_v17 = vld [vmem:[%s391_s0 + $0x38] sm:$0xff] }
   0x4   :  { %v18_v10 = vld [vmem:[%s391_s0 + $0x20] sm:$0xff]  ;;  %v42_v16 = vmul.f32 %v286_v2, %v19_v11  ;;  %v43_v20 = vmul.f32 %v286_v2, %v20_v12  ;;  %v44_v21 = vmul.f32 %v286_v2, %v21_v17  ;;  %v23_v27 = vld [vmem:[%s391_s0 + $0x48] sm:$0xff]  ;;  %v24_v32 = vld [vmem:[%s391_s0 + $0x50] sm:$0xff] }
   0x5   :  { %v60_v13 = vadd.f32 %v293_v5, %v37_v3  ;;  %v61_v14 = vadd.f32 %v293_v5, %v38_v4  ;;  %v41_v15 = vmul.f32 %v286_v2, %v18_v10  ;;  %v62_v18 = vadd.f32 %v293_v5, %v39_v8  ;;  %v22_v22 = vld [vmem:[%s391_s0 + $0x40] sm:$0xff]  ;;  %v25_v33 = vld [vmem:[%s391_s0 + $0x58] sm:$0xff]  ;;  %v27_v39 = vld [vmem:[%s391_s0 + $0x68] sm:$0xff] }
   0x6   :  { %v63_v19 = vadd.f32 %v293_v5, %v40_v9  ;;  %v65_v26 = vadd.f32 %v293_v5, %v42_v16  ;;  %v66_v30 = vadd.f32 %v293_v5, %v43_v20  ;;  %v67_v31 = vadd.f32 %v293_v5, %v44_v21  ;;  %v26_v38 = vld [vmem:[%s391_s0 + $0x60] sm:$0xff]  ;;  %v28_v44 = vld [vmem:[%s391_s0 + $0x70] sm:$0xff]  ;;  %v29_v49 = vld [vmem:[%s391_s0 + $0x78] sm:$0xff] }
   0x7   :  { %v76_v23 = vmax.f32 %v60_v13, 0.0  ;;  %v77_v24 = vmax.f32 %v61_v14, 0.0  ;;  %v64_v25 = vadd.f32 %v293_v5, %v41_v15  ;;  %v78_v28 = vmax.f32 %v62_v18, 0.0 }
   0x8   :  { %v79_v29 = vmax.f32 %v63_v19, 0.0  ;;  %v81_v36 = vmax.f32 %v65_v26, 0.0  ;;  %v45_v37 = vmul.f32 %v286_v2, %v22_v22  ;;  %v82_v41 = vmax.f32 %v66_v30, 0.0 }
   0x9   :  { %v213_v34 = vpack.c.bf16 %v77_v24, %v76_v23  ;;  %v80_v35 = vmax.f32 %v64_v25, 0.0  ;;  %v83_v42 = vmax.f32 %v67_v31, 0.0  ;;  %v46_v43 = vmul.f32 %v286_v2, %v23_v27 }
   0xa   :  { %v218_v40 = vpack.c.bf16 %v79_v29, %v78_v28  ;;  %v68_v46 = vadd.f32 %v293_v5, %v45_v37  ;;  %v47_v47 = vmul.f32 %v286_v2, %v24_v32  ;;  %v48_v48 = vmul.f32 %v286_v2, %v25_v33 }
   0xb   :  { %214 = vst [vmem:[%s394_s3] sm:$0xff] %v213_v34   ;;  %v223_v45 = vpack.c.bf16 %v81_v36, %v80_v35  ;;  %v228_v50 = vpack.c.bf16 %v83_v42, %v82_v41  ;;  %v69_v51 = vadd.f32 %v293_v5, %v46_v43  ;;  %v49_v52 = vmul.f32 %v286_v2, %v26_v38 }
   0xc   :  { %250 = vst [vmem:[%s394_s3 + $0x8] sm:$0xff] %v218_v40   ;;  %v50_v53 = vmul.f32 %v286_v2, %v27_v39  ;;  %v84_v54 = vmax.f32 %v68_v46, 0.0  ;;  %v70_v55 = vadd.f32 %v293_v5, %v47_v47  ;;  %v71_v56 = vadd.f32 %v293_v5, %v48_v48 }
   0xd   :  { %251 = vst [vmem:[%s394_s3 + $0x10] sm:$0xff] %v223_v45   ;;  %v51_v57 = vmul.f32 %v286_v2, %v28_v44  ;;  %252 = vst [vmem:[%s394_s3 + $0x18] sm:$0xff] %v228_v50   ;;  %v85_v58 = vmax.f32 %v69_v51, 0.0  ;;  %v72_v59 = vadd.f32 %v293_v5, %v49_v52  ;;  %v52_v61 = vmul.f32 %v286_v2, %v29_v49 }
   0xe   :  { %v73_v60 = vadd.f32 %v293_v5, %v50_v53  ;;  %v86_v62 = vmax.f32 %v70_v55, 0.0  ;;  %v87_v63 = vmax.f32 %v71_v56, 0.0 }
   0xf   :  { %v74_v0 = vadd.f32 %v293_v5, %v51_v57  ;;  %v233_v1 = vpack.c.bf16 %v85_v58, %v84_v54  ;;  %v88_v3 = vmax.f32 %v72_v59, 0.0  ;;  %v75_v6 = vadd.f32 %v293_v5, %v52_v61 }
  0x10   :  { %v89_v4 = vmax.f32 %v73_v60, 0.0  ;;  %v238_v7 = vpack.c.bf16 %v87_v63, %v86_v62 }
  0x11   :  { %v90_v8 = vmax.f32 %v74_v0, 0.0  ;;  %253 = vst [vmem:[%s394_s3 + $0x20] sm:$0xff] %v233_v1   ;;  %v91_v10 = vmax.f32 %v75_v6, 0.0 }
  0x12   :  { %v243_v9 = vpack.c.bf16 %v89_v4, %v88_v3  ;;  %254 = vst [vmem:[%s394_s3 + $0x28] sm:$0xff] %v238_v7  }
  0x13   :  { %v248_v2 = vpack.c.bf16 %v91_v10, %v90_v8 }
  0x14   :  { %255 = vst [vmem:[%s394_s3 + $0x30] sm:$0xff] %v243_v9  }
  0x15   :  { %256 = vst [vmem:[%s394_s3 + $0x38] sm:$0xff] %v248_v2  }

// kernel: resblock_forward.4
= control target key start
LH: loop header
LB: loop body
LE: loop exit
PB: predicated region body
PF: predicated region fallthrough
CT: control target
= control target key end

     0   :  { %vm313_vm0 = vcmask 1040384   ;;  %s539_s1 = inlined_call_operand.vmem [shape: bf16[128,128], index: 1, kind: input, shape index: {}]   ;;  %s540_s0 = inlined_call_operand.vmem [shape: bf16[128,128], index: 0, kind: input, shape index: {}]   ;;  %s541_s2 = inlined_call_operand.vmem [shape: f32[128,128], index: 2, kind: output, shape index: {0}]   ;;  %s542_s3 = inlined_call_operand.vmem [shape: f32[1,2,128], index: 3, kind: output, shape index: {1}]  }
   0x1   :  { %v404_v0 = vld [vmem:[%s539_s1] sm:$0xff]   ;;  %v405_v1 = vld [vmem:[%s539_s1 + $0x8] sm:$0xff]   ;;  %v406_v2 = vld [vmem:[%s539_s1 + $0x10] sm:$0xff]  }
   0x2   :  { %356 = vmatprep.subr.bf16.mxu0 %v404_v0  ;;  %388 = vmatprep.subr.bf16.mxu1 %v404_v0  ;;  %v407_v3 = vld [vmem:[%s539_s1 + $0x18] sm:$0xff]   ;;  %v412_v4 = vld [vmem:[%s540_s0] sm:$0xff]   ;;  %v409_v7 = vld [vmem:[%s539_s1 + $0x28] sm:$0xff]  }
   0x3   :  { %357 = vmatpush3.bf16.msra.mxu0 %v404_v0  ;;  %396 = vmatpush3.bf16.msra.mxu1 %v404_v0  ;;  %v408_v5 = vld [vmem:[%s539_s1 + $0x20] sm:$0xff]   ;;  %v410_v8 = vld [vmem:[%s539_s1 + $0x30] sm:$0xff]   ;;  %v411_v9 = vld [vmem:[%s539_s1 + $0x38] sm:$0xff]  }
   0x4   :  { %358 = vmatprep.subr.bf16.mxu0 %v405_v1  ;;  %389 = vmatprep.subr.bf16.mxu1 %v405_v1  ;;  %v416_v6 = vld [vmem:[%s540_s0 + $0x20] sm:$0xff]   ;;  %v413_v10 = vld [vmem:[%s540_s0 + $0x8] sm:$0xff]   ;;  %v414_v12 = vld [vmem:[%s540_s0 + $0x10] sm:$0xff]  }
   0x5   :  { %372 = vmatprep.mubr.bf16.mxu0 %v412_v4  ;;  %380 = vmatprep.mubr.bf16.mxu1 %v416_v6  ;;  %v417_v11 = vld [vmem:[%s540_s0 + $0x28] sm:$0xff]   ;;  %v418_v13 = vld [vmem:[%s540_s0 + $0x30] sm:$0xff]   ;;  %v415_v14 = vld [vmem:[%s540_s0 + $0x18] sm:$0xff]  }
   0x6   :  { %v419_v15 = vld [vmem:[%s540_s0 + $0x38] sm:$0xff]  }
   0x7   :  { %359 = vmatpush3.bf16.msra.mxu0 %v405_v1  ;;  %397 = vmatpush3.bf16.msra.mxu1 %v405_v1 }
   0x8   :  { %360 = vmatprep.subr.bf16.mxu0 %v406_v2  ;;  %390 = vmatprep.subr.bf16.mxu1 %v406_v2 }
   0xb   :  { %361 = vmatpush3.bf16.msra.mxu0 %v406_v2  ;;  %398 = vmatpush3.bf16.msra.mxu1 %v406_v2 }
   0xc   :  { %362 = vmatprep.subr.bf16.mxu0 %v407_v3  ;;  %391 = vmatprep.subr.bf16.mxu1 %v407_v3 }
   0xf   :  { %363 = vmatpush3.bf16.msra.mxu0 %v407_v3  ;;  %399 = vmatpush3.bf16.msra.mxu1 %v407_v3 }
  0x10   :  { %364 = vmatprep.subr.bf16.mxu0 %v408_v5  ;;  %392 = vmatprep.subr.bf16.mxu1 %v408_v5 }
  0x13   :  { %365 = vmatpush3.bf16.msra.mxu0 %v408_v5  ;;  %400 = vmatpush3.bf16.msra.mxu1 %v408_v5 }
  0x14   :  { %366 = vmatprep.subr.bf16.mxu0 %v409_v7  ;;  %393 = vmatprep.subr.bf16.mxu1 %v409_v7 }
  0x17   :  { %367 = vmatpush3.bf16.msra.mxu0 %v409_v7  ;;  %401 = vmatpush3.bf16.msra.mxu1 %v409_v7 }
  0x18   :  { %368 = vmatprep.subr.bf16.mxu0 %v410_v8  ;;  %394 = vmatprep.subr.bf16.mxu1 %v410_v8 }
  0x1b   :  { %369 = vmatpush3.bf16.msra.mxu0 %v410_v8  ;;  %402 = vmatpush3.bf16.msra.mxu1 %v410_v8 }
  0x1c   :  { %370 = vmatprep.subr.bf16.mxu0 %v411_v9  ;;  %395 = vmatprep.subr.bf16.mxu1 %v411_v9 }
  0x1f   :  { %371 = vmatpush3.bf16.msra.mxu0 %v411_v9  ;;  %403 = vmatpush3.bf16.msra.mxu1 %v411_v9 }
  0x22   :  { %373 = vmatmul.mubr.bf16.vlgmr.msra.gmra.mrb[0].mxu0 %v413_v10  ;;  %381 = vmatmul.mubr.bf16.vlgmr.msra.gmra.mrb[0].mxu1 %v417_v11 }
  0x23   :  { %376 = vmatprep.mubr.bf16.mxu0 %v414_v12  ;;  %384 = vmatprep.mubr.bf16.mxu1 %v418_v13 }
  0x2a   :  { %377 = vmatmul.mubr.bf16.gmra.mrb[4].mxu0 %v415_v14  ;;  %385 = vmatmul.mubr.bf16.gmra.mrb[4].mxu1 %v419_v15 }
  0xf5   :  { %v374_v16 = vpop.f32.mrb[0].mxu0  ;;  %v382_v17 = vpop.f32.mrb[0].mxu1 }
  0xf6   :  { %241 = vst [vmem:[%s541_s2 + $0x10] sm:$0xff] %v374_v16  ;;  %v176_v18 = vpop.f32.mrb[1].mxu0  ;;  %249 = vst [vmem:[%s541_s2 + $0x50] sm:$0xff] %v382_v17  ;;  %v208_v19 = vpop.f32.mrb[1].mxu1  ;;  %v278_v27 = vmul.f32 %v374_v16, %v374_v16  ;;  %v286_v59 = vmul.f32 %v382_v17, %v382_v17 }
  0xf7   :  { %239 = vst [vmem:[%s541_s2] sm:$0xff] %v176_v18  ;;  %v375_v20 = vpop.f32.mrb[2].mxu0  ;;  %247 = vst [vmem:[%s541_s2 + $0x40] sm:$0xff] %v208_v19  ;;  %v383_v21 = vpop.f32.mrb[2].mxu1  ;;  %v276_v24 = vmul.f32 %v176_v18, %v176_v18  ;;  %v284_v53 = vmul.f32 %v208_v19, %v208_v19 }
  0xf8   :  { %242 = vst [vmem:[%s541_s2 + $0x18] sm:$0xff] %v375_v20  ;;  %v179_v22 = vpop.f32.mrb[3].mxu0  ;;  %250 = vst [vmem:[%s541_s2 + $0x58] sm:$0xff] %v383_v21  ;;  %v211_v23 = vpop.f32.mrb[3].mxu1  ;;  %v279_v30 = vmul.f32 %v375_v20, %v375_v20  ;;  %v287_v62 = vmul.f32 %v383_v21, %v383_v21 }
  0xf9   :  { %240 = vst [vmem:[%s541_s2 + $0x8] sm:$0xff] %v179_v22  ;;  %v255_v25 = vadd.f32 %v179_v22, %v176_v18  ;;  %v277_v26 = vmul.f32 %v179_v22, %v179_v22  ;;  %248 = vst [vmem:[%s541_s2 + $0x48] sm:$0xff] %v211_v23  ;;  %v285_v58 = vmul.f32 %v211_v23, %v211_v23 }
  0xfb   :  { %v256_v28 = vadd.f32 %v374_v16, %v255_v25  ;;  %v292_v29 = vadd.f32 %v277_v26, %v276_v24 }
  0xfd   :  { %v293_v31 = vadd.f32 %v292_v29, %v278_v27  ;;  %v378_v32 = vpop.f32.mrb[4].mxu0  ;;  %v257_v33 = vadd.f32 %v375_v20, %v256_v28  ;;  %v386_v34 = vpop.f32.mrb[4].mxu1 }
  0xfe   :  { %245 = vst [vmem:[%s541_s2 + $0x30] sm:$0xff] %v378_v32  ;;  %v192_v35 = vpop.f32.mrb[5].mxu0  ;;  %253 = vst [vmem:[%s541_s2 + $0x70] sm:$0xff] %v386_v34  ;;  %v224_v36 = vpop.f32.mrb[5].mxu1  ;;  %v282_v47 = vmul.f32 %v378_v32, %v378_v32  ;;  %v290_v7 = vmul.f32 %v386_v34, %v386_v34 }
  0xff   :  { %243 = vst [vmem:[%s541_s2 + $0x20] sm:$0xff] %v192_v35  ;;  %v258_v37 = vadd.f32 %v257_v33, %v192_v35  ;;  %v280_v38 = vmul.f32 %v192_v35, %v192_v35  ;;  %v294_v39 = vadd.f32 %v293_v31, %v279_v30  ;;  %v379_v40 = vpop.f32.mrb[6].mxu0  ;;  %251 = vst [vmem:[%s541_s2 + $0x60] sm:$0xff] %v224_v36  ;;  %v387_v41 = vpop.f32.mrb[6].mxu1 }
 0x100   :  { %246 = vst [vmem:[%s541_s2 + $0x38] sm:$0xff] %v379_v40  ;;  %v195_v42 = vpop.f32.mrb[7].mxu0  ;;  %254 = vst [vmem:[%s541_s2 + $0x78] sm:$0xff] %v387_v41  ;;  %v227_v43 = vpop.f32.mrb[7].mxu1  ;;  %v283_v50 = vmul.f32 %v379_v40, %v379_v40  ;;  %v288_v1 = vmul.f32 %v224_v36, %v224_v36  ;;  %v291_v10 = vmul.f32 %v387_v41, %v387_v41 }
 0x101   :  { %v295_v44 = vadd.f32 %v294_v39, %v280_v38  ;;  %244 = vst [vmem:[%s541_s2 + $0x28] sm:$0xff] %v195_v42  ;;  %v259_v45 = vadd.f32 %v258_v37, %v195_v42  ;;  %v281_v46 = vmul.f32 %v195_v42, %v195_v42  ;;  %252 = vst [vmem:[%s541_s2 + $0x68] sm:$0xff] %v227_v43 }
 0x102   :  { %v289_v6 = vmul.f32 %v227_v43, %v227_v43 }
 0x103   :  { %v260_v48 = vadd.f32 %v378_v32, %v259_v45  ;;  %v296_v49 = vadd.f32 %v295_v44, %v281_v46 }
 0x105   :  { %v297_v51 = vadd.f32 %v296_v49, %v282_v47  ;;  %v261_v52 = vadd.f32 %v379_v40, %v260_v48 }
 0x107   :  { %v262_v54 = vadd.f32 %v261_v52, %v208_v19  ;;  %v298_v55 = vadd.f32 %v297_v51, %v283_v50 }
 0x109   :  { %v299_v56 = vadd.f32 %v298_v55, %v284_v53  ;;  %v263_v57 = vadd.f32 %v262_v54, %v211_v23 }
 0x10b   :  { %v264_v60 = vadd.f32 %v382_v17, %v263_v57  ;;  %v300_v61 = vadd.f32 %v299_v56, %v285_v58 }
 0x10d   :  { %v301_v63 = vadd.f32 %v300_v61, %v286_v59  ;;  %v265_v0 = vadd.f32 %v383_v21, %v264_v60 }
 0x10f   :  { %v266_v2 = vadd.f32 %v265_v0, %v224_v36  ;;  %v302_v3 = vadd.f32 %v301_v63, %v287_v62 }
 0x111   :  { %v303_v4 = vadd.f32 %v302_v3, %v288_v1  ;;  %v267_v5 = vadd.f32 %v266_v2, %v227_v43 }
 0x113   :  { %v268_v8 = vadd.f32 %v386_v34, %v267_v5  ;;  %v304_v9 = vadd.f32 %v303_v4, %v289_v6 }
 0x115   :  { %v269_v11 = vadd.f32 %v387_v41, %v268_v8  ;;  %v305_v12 = vadd.f32 %v304_v9, %v290_v7 }
 0x117   :  { %v270_v13 = vrot.slane %v269_v11, 4  ;;  %v306_v14 = vadd.f32 %v305_v12, %v291_v10 }
 0x119   :  { %v271_v15 = vadd.f32 %v270_v13, %v269_v11  ;;  %v307_v16 = vrot.slane %v306_v14, 4 }
 0x11b   :  { %v272_v17 = vrot.slane %v271_v15, 2  ;;  %v308_v18 = vadd.f32 %v307_v16, %v306_v14 }
 0x11d   :  { %v273_v19 = vadd.f32 %v272_v17, %v271_v15  ;;  %v309_v20 = vrot.slane %v308_v18, 2 }
 0x11f   :  { %v274_v21 = vrot.slane %v273_v19, 1  ;;  %v310_v22 = vadd.f32 %v309_v20, %v308_v18 }
 0x121   :  { %v311_v23 = vrot.slane %v310_v22, 1  ;;  %v275_v24 = vadd.f32 %v274_v21, %v273_v19 }
 0x123   :  { %v312_v25 = vadd.f32 %v311_v23, %v310_v22 }
 0x125   :  { %v314_v26 = vsel %vm313_vm0, %v275_v24, %v312_v25 }
 0x126   :  { %315 = vst [vmem:[%s542_s3] sm:$0x3] %v314_v26 }

// kernel: resblock_forward.6
= control target key start
LH: loop header
LB: loop body
LE: loop exit
PB: predicated region body
PF: predicated region fallthrough
CT: control target
= control target key end

     0   :  { %vm321_vm0 = vcmask 1040384   ;;  %s1039_s1 = inlined_call_operand.vmem [shape: bf16[128,128], index: 1, kind: input, shape index: {}]   ;;  %s1040_s3 = inlined_call_operand.vmem [shape: bf16[128,128], index: 3, kind: input, shape index: {}]   ;;  %s1041_s0 = inlined_call_operand.vmem [shape: bf16[128,128], index: 0, kind: input, shape index: {}]   ;;  %s1042_s2 = inlined_call_operand.vmem [shape: bf16[128,128], index: 2, kind: input, shape index: {}]   ;;  %s1043_s4 = inlined_call_operand.vmem [shape: f32[128,128], index: 4, kind: output, shape index: {0}]   ;;  %s1044_s5 = inlined_call_operand.vmem [shape: f32[128,128], index: 5, kind: output, shape index: {1}]   ;;  %s1045_s6 = inlined_call_operand.vmem [shape: f32[1,2,128], index: 6, kind: output, shape index: {2}]   ;;  %s1046_s7 = inlined_call_operand.vmem [shape: f32[1,2,128], index: 7, kind: output, shape index: {3}]  }
   0x1   :  { %v769_v0 = vld [vmem:[%s1039_s1] sm:$0xff]   ;;  %v771_v2 = vld [vmem:[%s1039_s1 + $0x8] sm:$0xff]   ;;  %v773_v4 = vld [vmem:[%s1039_s1 + $0x10] sm:$0xff]  }
   0x2   :  { %v770_v1 = vld [vmem:[%s1040_s3] sm:$0xff]   ;;  %705 = vmatprep.subr.bf16.mxu0 %v769_v0  ;;  %v772_v3 = vld [vmem:[%s1040_s3 + $0x8] sm:$0xff]   ;;  %v774_v5 = vld [vmem:[%s1040_s3 + $0x10] sm:$0xff]  }
   0x3   :  { %737 = vmatprep.subr.bf16.mxu1 %v770_v1  ;;  %706 = vmatpush3.bf16.msra.mxu0 %v769_v0  ;;  %v775_v6 = vld [vmem:[%s1039_s1 + $0x18] sm:$0xff]   ;;  %v777_v8 = vld [vmem:[%s1039_s1 + $0x20] sm:$0xff]   ;;  %v779_v10 = vld [vmem:[%s1039_s1 + $0x28] sm:$0xff]  }
   0x4   :  { %738 = vmatpush3.bf16.msra.mxu1 %v770_v1  ;;  %707 = vmatprep.subr.bf16.mxu0 %v771_v2  ;;  %v776_v7 = vld [vmem:[%s1040_s3 + $0x18] sm:$0xff]   ;;  %v778_v9 = vld [vmem:[%s1040_s3 + $0x20] sm:$0xff]   ;;  %v780_v11 = vld [vmem:[%s1040_s3 + $0x28] sm:$0xff]  }
   0x5   :  { %739 = vmatprep.subr.bf16.mxu1 %v772_v3  ;;  %v785_v12 = vld [vmem:[%s1041_s0] sm:$0xff]   ;;  %v781_v14 = vld [vmem:[%s1039_s1 + $0x30] sm:$0xff]   ;;  %v783_v16 = vld [vmem:[%s1039_s1 + $0x38] sm:$0xff]  }
   0x6   :  { %v786_v13 = vld [vmem:[%s1042_s2] sm:$0xff]   ;;  %721 = vmatprep.mubr.bf16.mxu0 %v785_v12  ;;  %v782_v15 = vld [vmem:[%s1040_s3 + $0x30] sm:$0xff]   ;;  %v784_v17 = vld [vmem:[%s1040_s3 + $0x38] sm:$0xff]  }
   0x7   :  { %708 = vmatpush3.bf16.msra.mxu0 %v771_v2  ;;  %753 = vmatprep.mubr.bf16.mxu1 %v786_v13  ;;  %v787_v18 = vld [vmem:[%s1041_s0 + $0x8] sm:$0xff]   ;;  %v789_v20 = vld [vmem:[%s1041_s0 + $0x10] sm:$0xff]   ;;  %v791_v22 = vld [vmem:[%s1041_s0 + $0x18] sm:$0xff]  }
   0x8   :  { %740 = vmatpush3.bf16.msra.mxu1 %v772_v3  ;;  %709 = vmatprep.subr.bf16.mxu0 %v773_v4  ;;  %v788_v19 = vld [vmem:[%s1042_s2 + $0x8] sm:$0xff]   ;;  %v790_v21 = vld [vmem:[%s1042_s2 + $0x10] sm:$0xff]   ;;  %v792_v23 = vld [vmem:[%s1042_s2 + $0x18] sm:$0xff]  }
   0x9   :  { %741 = vmatprep.subr.bf16.mxu1 %v774_v5  ;;  %v793_v24 = vld [vmem:[%s1041_s0 + $0x20] sm:$0xff]   ;;  %v795_v26 = vld [vmem:[%s1041_s0 + $0x28] sm:$0xff]   ;;  %v797_v28 = vld [vmem:[%s1041_s0 + $0x30] sm:$0xff]  }
   0xa   :  { %v794_v25 = vld [vmem:[%s1042_s2 + $0x20] sm:$0xff]   ;;  %v796_v27 = vld [vmem:[%s1042_s2 + $0x28] sm:$0xff]   ;;  %v798_v29 = vld [vmem:[%s1042_s2 + $0x30] sm:$0xff]  }
   0xb   :  { %710 = vmatpush3.bf16.msra.mxu0 %v773_v4  ;;  %v799_v30 = vld [vmem:[%s1041_s0 + $0x38] sm:$0xff]  }
   0xc   :  { %742 = vmatpush3.bf16.msra.mxu1 %v774_v5  ;;  %711 = vmatprep.subr.bf16.mxu0 %v775_v6  ;;  %v800_v31 = vld [vmem:[%s1042_s2 + $0x38] sm:$0xff]  }
   0xd   :  { %743 = vmatprep.subr.bf16.mxu1 %v776_v7 }
   0xf   :  { %712 = vmatpush3.bf16.msra.mxu0 %v775_v6 }
  0x10   :  { %744 = vmatpush3.bf16.msra.mxu1 %v776_v7  ;;  %713 = vmatprep.subr.bf16.mxu0 %v777_v8 }
  0x11   :  { %745 = vmatprep.subr.bf16.mxu1 %v778_v9 }
  0x13   :  { %714 = vmatpush3.bf16.msra.mxu0 %v777_v8 }
  0x14   :  { %746 = vmatpush3.bf16.msra.mxu1 %v778_v9  ;;  %715 = vmatprep.subr.bf16.mxu0 %v779_v10 }
  0x15   :  { %747 = vmatprep.subr.bf16.mxu1 %v780_v11 }
  0x17   :  { %716 = vmatpush3.bf16.msra.mxu0 %v779_v10 }
  0x18   :  { %748 = vmatpush3.bf16.msra.mxu1 %v780_v11  ;;  %717 = vmatprep.subr.bf16.mxu0 %v781_v14 }
  0x19   :  { %749 = vmatprep.subr.bf16.mxu1 %v782_v15 }
  0x1b   :  { %718 = vmatpush3.bf16.msra.mxu0 %v781_v14 }
  0x1c   :  { %750 = vmatpush3.bf16.msra.mxu1 %v782_v15  ;;  %719 = vmatprep.subr.bf16.mxu0 %v783_v16 }
  0x1d   :  { %751 = vmatprep.subr.bf16.mxu1 %v784_v17 }
  0x1f   :  { %720 = vmatpush3.bf16.msra.mxu0 %v783_v16 }
  0x20   :  { %752 = vmatpush3.bf16.msra.mxu1 %v784_v17 }
  0x22   :  { %722 = vmatmul.mubr.bf16.vlgmr.msra.gmra.mrb[0].mxu0 %v787_v18 }
  0x23   :  { %754 = vmatmul.mubr.bf16.vlgmr.msra.gmra.mrb[0].mxu1 %v788_v19  ;;  %725 = vmatprep.mubr.bf16.mxu0 %v789_v20 }
  0x24   :  { %757 = vmatprep.mubr.bf16.mxu1 %v790_v21 }
  0x2a   :  { %726 = vmatmul.mubr.bf16.gmra.mrb[4].mxu0 %v791_v22 }
  0x2b   :  { %758 = vmatmul.mubr.bf16.gmra.mrb[4].mxu1 %v792_v23  ;;  %729 = vmatprep.mubr.bf16.mxu0 %v793_v24 }
  0x2c   :  { %761 = vmatprep.mubr.bf16.mxu1 %v794_v25 }
  0x32   :  { %730 = vmatmul.mubr.bf16.gmra.mrb[8].mxu0 %v795_v26 }
  0x33   :  { %762 = vmatmul.mubr.bf16.gmra.mrb[8].mxu1 %v796_v27  ;;  %733 = vmatprep.mubr.bf16.mxu0 %v797_v28 }
  0x34   :  { %765 = vmatprep.mubr.bf16.mxu1 %v798_v29 }
  0x3a   :  { %734 = vmatmul.mubr.bf16.gmra.mrb[12].mxu0 %v799_v30 }
  0x3b   :  { %766 = vmatmul.mubr.bf16.gmra.mrb[12].mxu1 %v800_v31 }
  0xf5   :  { %v723_v32 = vpop.f32.mrb[0].mxu0 }
  0xf6   :  { %249 = vst [vmem:[%s1043_s4 + $0x10] sm:$0xff] %v723_v32  ;;  %v755_v33 = vpop.f32.mrb[0].mxu1  ;;  %v184_v34 = vpop.f32.mrb[1].mxu0  ;;  %v286_v46 = vmul.f32 %v723_v32, %v723_v32 }
  0xf7   :  { %551 = vst [vmem:[%s1044_s5 + $0x10] sm:$0xff] %v755_v33  ;;  %247 = vst [vmem:[%s1043_s4] sm:$0xff] %v184_v34  ;;  %v486_v35 = vpop.f32.mrb[1].mxu1  ;;  %v724_v36 = vpop.f32.mrb[2].mxu0  ;;  %v284_v39 = vmul.f32 %v184_v34, %v184_v34  ;;  %v588_v49 = vmul.f32 %v755_v33, %v755_v33 }
  0xf8   :  { %549 = vst [vmem:[%s1044_s5] sm:$0xff] %v486_v35  ;;  %250 = vst [vmem:[%s1043_s4 + $0x18] sm:$0xff] %v724_v36  ;;  %v756_v37 = vpop.f32.mrb[2].mxu1  ;;  %v187_v38 = vpop.f32.mrb[3].mxu0  ;;  %v586_v43 = vmul.f32 %v486_v35, %v486_v35  ;;  %v287_v52 = vmul.f32 %v724_v36, %v724_v36 }
  0xf9   :  { %552 = vst [vmem:[%s1044_s5 + $0x18] sm:$0xff] %v756_v37  ;;  %248 = vst [vmem:[%s1043_s4 + $0x8] sm:$0xff] %v187_v38  ;;  %v263_v40 = vadd.f32 %v187_v38, %v184_v34  ;;  %v285_v41 = vmul.f32 %v187_v38, %v187_v38  ;;  %v489_v42 = vpop.f32.mrb[3].mxu1  ;;  %v589_v56 = vmul.f32 %v756_v37, %v756_v37 }
  0xfa   :  { %550 = vst [vmem:[%s1044_s5 + $0x8] sm:$0xff] %v489_v42  ;;  %v565_v44 = vadd.f32 %v489_v42, %v486_v35  ;;  %v587_v45 = vmul.f32 %v489_v42, %v489_v42 }
  0xfb   :  { %v264_v47 = vadd.f32 %v723_v32, %v263_v40  ;;  %v300_v48 = vadd.f32 %v285_v41, %v284_v39 }
  0xfc   :  { %v566_v50 = vadd.f32 %v755_v33, %v565_v44  ;;  %v602_v51 = vadd.f32 %v587_v45, %v586_v43 }
  0xfd   :  { %v301_v53 = vadd.f32 %v300_v48, %v286_v46  ;;  %v727_v54 = vpop.f32.mrb[4].mxu0  ;;  %v265_v55 = vadd.f32 %v724_v36, %v264_v47 }
  0xfe   :  { %v603_v57 = vadd.f32 %v602_v51, %v588_v49  ;;  %253 = vst [vmem:[%s1043_s4 + $0x30] sm:$0xff] %v727_v54  ;;  %v759_v58 = vpop.f32.mrb[4].mxu1  ;;  %v200_v59 = vpop.f32.mrb[5].mxu0  ;;  %v567_v60 = vadd.f32 %v756_v37, %v566_v50  ;;  %v290_v14 = vmul.f32 %v727_v54, %v727_v54 }
  0xff   :  { %555 = vst [vmem:[%s1044_s5 + $0x30] sm:$0xff] %v759_v58  ;;  %251 = vst [vmem:[%s1043_s4 + $0x20] sm:$0xff] %v200_v59  ;;  %v266_v61 = vadd.f32 %v265_v55, %v200_v59  ;;  %v288_v62 = vmul.f32 %v200_v59, %v200_v59  ;;  %v302_v63 = vadd.f32 %v301_v53, %v287_v52  ;;  %v502_v0 = vpop.f32.mrb[5].mxu1  ;;  %v728_v1 = vpop.f32.mrb[6].mxu0 }
 0x100   :  { %553 = vst [vmem:[%s1044_s5 + $0x20] sm:$0xff] %v502_v0  ;;  %v568_v2 = vadd.f32 %v567_v60, %v502_v0  ;;  %v590_v3 = vmul.f32 %v502_v0, %v502_v0  ;;  %v604_v4 = vadd.f32 %v603_v57, %v589_v56  ;;  %254 = vst [vmem:[%s1043_s4 + $0x38] sm:$0xff] %v728_v1  ;;  %v760_v5 = vpop.f32.mrb[6].mxu1  ;;  %v203_v6 = vpop.f32.mrb[7].mxu0 }
 0x101   :  { %v303_v7 = vadd.f32 %v302_v63, %v288_v62  ;;  %556 = vst [vmem:[%s1044_s5 + $0x38] sm:$0xff] %v760_v5  ;;  %252 = vst [vmem:[%s1043_s4 + $0x28] sm:$0xff] %v203_v6  ;;  %v267_v8 = vadd.f32 %v266_v61, %v203_v6  ;;  %v289_v9 = vmul.f32 %v203_v6, %v203_v6  ;;  %v505_v10 = vpop.f32.mrb[7].mxu1 }
 0x102   :  { %v605_v11 = vadd.f32 %v604_v4, %v590_v3  ;;  %554 = vst [vmem:[%s1044_s5 + $0x28] sm:$0xff] %v505_v10  ;;  %v569_v12 = vadd.f32 %v568_v2, %v505_v10  ;;  %v591_v13 = vmul.f32 %v505_v10, %v505_v10  ;;  %v592_v17 = vmul.f32 %v759_v58, %v759_v58 }
 0x103   :  { %v268_v15 = vadd.f32 %v727_v54, %v267_v8  ;;  %v304_v16 = vadd.f32 %v303_v7, %v289_v9  ;;  %v291_v20 = vmul.f32 %v728_v1, %v728_v1  ;;  %v593_v24 = vmul.f32 %v760_v5, %v760_v5 }
 0x104   :  { %v570_v18 = vadd.f32 %v759_v58, %v569_v12  ;;  %v606_v19 = vadd.f32 %v605_v11, %v591_v13 }
 0x105   :  { %v305_v21 = vadd.f32 %v304_v16, %v290_v14  ;;  %v731_v22 = vpop.f32.mrb[8].mxu0  ;;  %v269_v23 = vadd.f32 %v728_v1, %v268_v15 }
 0x106   :  { %v607_v25 = vadd.f32 %v606_v19, %v592_v17  ;;  %257 = vst [vmem:[%s1043_s4 + $0x50] sm:$0xff] %v731_v22  ;;  %v763_v26 = vpop.f32.mrb[8].mxu1  ;;  %v216_v27 = vpop.f32.mrb[9].mxu0  ;;  %v571_v28 = vadd.f32 %v760_v5, %v570_v18  ;;  %v294_v46 = vmul.f32 %v731_v22, %v731_v22 }
 0x107   :  { %559 = vst [vmem:[%s1044_s5 + $0x50] sm:$0xff] %v763_v26  ;;  %255 = vst [vmem:[%s1043_s4 + $0x40] sm:$0xff] %v216_v27  ;;  %v270_v29 = vadd.f32 %v269_v23, %v216_v27  ;;  %v292_v30 = vmul.f32 %v216_v27, %v216_v27  ;;  %v306_v31 = vadd.f32 %v305_v21, %v291_v20  ;;  %v518_v32 = vpop.f32.mrb[9].mxu1  ;;  %v732_v33 = vpop.f32.mrb[10].mxu0 }
 0x108   :  { %557 = vst [vmem:[%s1044_s5 + $0x40] sm:$0xff] %v518_v32  ;;  %v572_v34 = vadd.f32 %v571_v28, %v518_v32  ;;  %v594_v35 = vmul.f32 %v518_v32, %v518_v32  ;;  %v608_v36 = vadd.f32 %v607_v25, %v593_v24  ;;  %258 = vst [vmem:[%s1043_s4 + $0x58] sm:$0xff] %v732_v33  ;;  %v764_v37 = vpop.f32.mrb[10].mxu1  ;;  %v219_v38 = vpop.f32.mrb[11].mxu0 }
 0x109   :  { %v307_v39 = vadd.f32 %v306_v31, %v292_v30  ;;  %560 = vst [vmem:[%s1044_s5 + $0x58] sm:$0xff] %v764_v37  ;;  %256 = vst [vmem:[%s1043_s4 + $0x48] sm:$0xff] %v219_v38  ;;  %v271_v40 = vadd.f32 %v270_v29, %v219_v38  ;;  %v293_v41 = vmul.f32 %v219_v38, %v219_v38  ;;  %v521_v42 = vpop.f32.mrb[11].mxu1 }
 0x10a   :  { %v609_v43 = vadd.f32 %v608_v36, %v594_v35  ;;  %558 = vst [vmem:[%s1044_s5 + $0x48] sm:$0xff] %v521_v42  ;;  %v573_v44 = vadd.f32 %v572_v34, %v521_v42  ;;  %v595_v45 = vmul.f32 %v521_v42, %v521_v42  ;;  %v596_v49 = vmul.f32 %v763_v26, %v763_v26 }
 0x10b   :  { %v272_v47 = vadd.f32 %v731_v22, %v271_v40  ;;  %v308_v48 = vadd.f32 %v307_v39, %v293_v41  ;;  %v295_v52 = vmul.f32 %v732_v33, %v732_v33  ;;  %v597_v56 = vmul.f32 %v764_v37, %v764_v37 }
 0x10c   :  { %v574_v50 = vadd.f32 %v763_v26, %v573_v44  ;;  %v610_v51 = vadd.f32 %v609_v43, %v595_v45 }
 0x10d   :  { %v309_v53 = vadd.f32 %v308_v48, %v294_v46  ;;  %v735_v54 = vpop.f32.mrb[12].mxu0  ;;  %v273_v55 = vadd.f32 %v732_v33, %v272_v47 }
 0x10e   :  { %v611_v57 = vadd.f32 %v610_v51, %v596_v49  ;;  %261 = vst [vmem:[%s1043_s4 + $0x70] sm:$0xff] %v735_v54  ;;  %v767_v58 = vpop.f32.mrb[12].mxu1  ;;  %v232_v59 = vpop.f32.mrb[13].mxu0  ;;  %v575_v60 = vadd.f32 %v764_v37, %v574_v50  ;;  %v298_v14 = vmul.f32 %v735_v54, %v735_v54 }
 0x10f   :  { %563 = vst [vmem:[%s1044_s5 + $0x70] sm:$0xff] %v767_v58  ;;  %259 = vst [vmem:[%s1043_s4 + $0x60] sm:$0xff] %v232_v59  ;;  %v274_v61 = vadd.f32 %v273_v55, %v232_v59  ;;  %v296_v62 = vmul.f32 %v232_v59, %v232_v59  ;;  %v310_v63 = vadd.f32 %v309_v53, %v295_v52  ;;  %v534_v0 = vpop.f32.mrb[13].mxu1  ;;  %v736_v1 = vpop.f32.mrb[14].mxu0 }
 0x110   :  { %561 = vst [vmem:[%s1044_s5 + $0x60] sm:$0xff] %v534_v0  ;;  %v576_v2 = vadd.f32 %v575_v60, %v534_v0  ;;  %v598_v3 = vmul.f32 %v534_v0, %v534_v0  ;;  %v612_v4 = vadd.f32 %v611_v57, %v597_v56  ;;  %262 = vst [vmem:[%s1043_s4 + $0x78] sm:$0xff] %v736_v1  ;;  %v768_v5 = vpop.f32.mrb[14].mxu1  ;;  %v235_v6 = vpop.f32.mrb[15].mxu0 }
 0x111   :  { %v311_v7 = vadd.f32 %v310_v63, %v296_v62  ;;  %564 = vst [vmem:[%s1044_s5 + $0x78] sm:$0xff] %v768_v5  ;;  %260 = vst [vmem:[%s1043_s4 + $0x68] sm:$0xff] %v235_v6  ;;  %v275_v8 = vadd.f32 %v274_v61, %v235_v6  ;;  %v297_v9 = vmul.f32 %v235_v6, %v235_v6  ;;  %v537_v10 = vpop.f32.mrb[15].mxu1 }
 0x112   :  { %v613_v11 = vadd.f32 %v612_v4, %v598_v3  ;;  %562 = vst [vmem:[%s1044_s5 + $0x68] sm:$0xff] %v537_v10  ;;  %v577_v12 = vadd.f32 %v576_v2, %v537_v10  ;;  %v599_v13 = vmul.f32 %v537_v10, %v537_v10  ;;  %v600_v17 = vmul.f32 %v767_v58, %v767_v58 }
 0x113   :  { %v276_v15 = vadd.f32 %v735_v54, %v275_v8  ;;  %v312_v16 = vadd.f32 %v311_v7, %v297_v9  ;;  %v299_v20 = vmul.f32 %v736_v1, %v736_v1  ;;  %v601_v23 = vmul.f32 %v768_v5, %v768_v5 }
 0x114   :  { %v578_v18 = vadd.f32 %v767_v58, %v577_v12  ;;  %v614_v19 = vadd.f32 %v613_v11, %v599_v13 }
 0x115   :  { %v277_v21 = vadd.f32 %v736_v1, %v276_v15  ;;  %v313_v22 = vadd.f32 %v312_v16, %v298_v14 }
 0x116   :  { %v579_v24 = vadd.f32 %v768_v5, %v578_v18  ;;  %v615_v25 = vadd.f32 %v614_v19, %v600_v17 }
 0x117   :  { %v278_v26 = vrot.slane %v277_v21, 4  ;;  %v314_v27 = vadd.f32 %v313_v22, %v299_v20 }
 0x118   :  { %v580_v28 = vrot.slane %v579_v24, 4  ;;  %v616_v29 = vadd.f32 %v615_v25, %v601_v23 }
 0x119   :  { %v279_v30 = vadd.f32 %v278_v26, %v277_v21  ;;  %v315_v31 = vrot.slane %v314_v27, 4 }
 0x11a   :  { %v581_v32 = vadd.f32 %v580_v28, %v579_v24  ;;  %v617_v33 = vrot.slane %v616_v29, 4 }
 0x11b   :  { %v280_v34 = vrot.slane %v279_v30, 2  ;;  %v316_v35 = vadd.f32 %v315_v31, %v314_v27 }
 0x11c   :  { %v582_v36 = vrot.slane %v581_v32, 2  ;;  %v618_v37 = vadd.f32 %v617_v33, %v616_v29 }
 0x11d   :  { %v281_v38 = vadd.f32 %v280_v34, %v279_v30  ;;  %v317_v39 = vrot.slane %v316_v35, 2 }
 0x11e   :  { %v583_v40 = vadd.f32 %v582_v36, %v581_v32  ;;  %v619_v41 = vrot.slane %v618_v37, 2 }
 0x11f   :  { %v282_v42 = vrot.slane %v281_v38, 1  ;;  %v318_v43 = vadd.f32 %v317_v39, %v316_v35 }
 0x120   :  { %v584_v44 = vrot.slane %v583_v40, 1  ;;  %v620_v45 = vadd.f32 %v619_v41, %v618_v37 }
 0x121   :  { %v319_v46 = vrot.slane %v318_v43, 1  ;;  %v283_v48 = vadd.f32 %v282_v42, %v281_v38 }
 0x122   :  { %v621_v47 = vrot.slane %v620_v45, 1  ;;  %v585_v50 = vadd.f32 %v584_v44, %v583_v40 }
 0x123   :  { %v320_v49 = vadd.f32 %v319_v46, %v318_v43 }
 0x124   :  { %v622_v51 = vadd.f32 %v621_v47, %v620_v45 }
 0x125   :  { %v322_v52 = vsel %vm321_vm0, %v283_v48, %v320_v49 }
 0x126   :  { %323 = vst [vmem:[%s1045_s6] sm:$0x3] %v322_v52  ;;  %v623_v53 = vsel %vm321_vm0, %v585_v50, %v622_v51 }
 0x127   :  { %624 = vst [vmem:[%s1046_s7] sm:$0x3] %v623_v53 }

// kernel: resblock_forward.7
= control target key start
LH: loop header
LB: loop body
LE: loop exit
PB: predicated region body
PF: predicated region fallthrough
CT: control target
= control target key end

     0   :  { %s466_s0 = inlined_call_operand.vmem [shape: f32[128,128], index: 0, kind: input, shape index: {}]   ;;  %s467_s1 = inlined_call_operand.vmem [shape: f32[1,128], index: 1, kind: input, shape index: {}]   ;;  %s468_s2 = inlined_call_operand.vmem [shape: f32[1,128], index: 2, kind: input, shape index: {}]   ;;  %s469_s3 = inlined_call_operand.vmem [shape: f32[128,128], index: 3, kind: input, shape index: {}]   ;;  %s470_s4 = inlined_call_operand.vmem [shape: f32[1,128], index: 4, kind: input, shape index: {}]   ;;  %s471_s5 = inlined_call_operand.vmem [shape: f32[1,128], index: 5, kind: input, shape index: {}]   ;;  %s472_s6 = inlined_call_operand.vmem [shape: f32[128,128], index: 6, kind: output, shape index: {}]  }
   0x1   :  { %v23_v0 = vld [vmem:[%s466_s0] sm:$0xff]  ;;  %v24_v8 = vld [vmem:[%s466_s0 + $0x8] sm:$0xff]  ;;  %v25_v10 = vld [vmem:[%s466_s0 + $0x10] sm:$0xff] }
   0x2   :  { %v244_v1 = vld [vmem:[%s467_s1] ss:$0 sm:$0xff]  ;;  %v86_v9 = vld [vmem:[%s469_s3 + $0x8] sm:$0xff]  ;;  %v87_v15 = vld [vmem:[%s469_s3 + $0x10] sm:$0xff] }
   0x3   :  { %v249_v2 = vld [vmem:[%s468_s2] ss:$0 sm:$0xff]  ;;  %v46_v3 = vmul.f32 %v244_v1, %v23_v0  ;;  %v47_v12 = vmul.f32 %v244_v1, %v24_v8  ;;  %v48_v14 = vmul.f32 %v244_v1, %v25_v10  ;;  %v26_v16 = vld [vmem:[%s466_s0 + $0x18] sm:$0xff]  ;;  %v28_v23 = vld [vmem:[%s466_s0 + $0x28] sm:$0xff] }
   0x4   :  { %v85_v4 = vld [vmem:[%s469_s3] sm:$0xff]  ;;  %v88_v17 = vld [vmem:[%s469_s3 + $0x18] sm:$0xff]  ;;  %v49_v19 = vmul.f32 %v244_v1, %v26_v16  ;;  %v90_v28 = vld [vmem:[%s469_s3 + $0x28] sm:$0xff]  ;;  %v51_v33 = vmul.f32 %v244_v1, %v28_v23 }
   0x5   :  { %v258_v5 = vld [vmem:[%s470_s4] ss:$0 sm:$0xff]  ;;  %v69_v11 = vadd.f32 %v249_v2, %v46_v3  ;;  %v70_v25 = vadd.f32 %v249_v2, %v47_v12  ;;  %v71_v26 = vadd.f32 %v249_v2, %v48_v14  ;;  %v29_v29 = vld [vmem:[%s466_s0 + $0x30] sm:$0xff]  ;;  %v30_v39 = vld [vmem:[%s466_s0 + $0x38] sm:$0xff] }
   0x6   :  { %v108_v6 = vmul.f32 %v258_v5, %v85_v4  ;;  %v264_v7 = vld [vmem:[%s471_s5] ss:$0 sm:$0xff]  ;;  %v109_v13 = vmul.f32 %v258_v5, %v86_v9  ;;  %v110_v18 = vmul.f32 %v258_v5, %v87_v15  ;;  %v111_v20 = vmul.f32 %v258_v5, %v88_v17  ;;  %v91_v30 = vld [vmem:[%s469_s3 + $0x30] sm:$0xff]  ;;  %v92_v44 = vld [vmem:[%s469_s3 + $0x38] sm:$0xff] }
   0x7   :  { %v27_v21 = vld [vmem:[%s466_s0 + $0x20] sm:$0xff]  ;;  %v72_v31 = vadd.f32 %v249_v2, %v49_v19  ;;  %v113_v34 = vmul.f32 %v258_v5, %v90_v28  ;;  %v74_v41 = vadd.f32 %v249_v2, %v51_v33  ;;  %v52_v42 = vmul.f32 %v244_v1, %v29_v29  ;;  %v32_v55 = vld [vmem:[%s466_s0 + $0x48] sm:$0xff]  ;;  %v33_v3 = vld [vmem:[%s466_s0 + $0x50] sm:$0xff] }
   0x8   :  { %v89_v22 = vld [vmem:[%s469_s3 + $0x20] sm:$0xff]  ;;  %v124_v24 = vadd.f32 %v108_v6, %v69_v11  ;;  %v50_v27 = vmul.f32 %v244_v1, %v27_v21  ;;  %v125_v36 = vadd.f32 %v109_v13, %v70_v25  ;;  %v126_v37 = vadd.f32 %v110_v18, %v71_v26  ;;  %v94_v60 = vld [vmem:[%s469_s3 + $0x48] sm:$0xff]  ;;  %v95_v4 = vld [vmem:[%s469_s3 + $0x50] sm:$0xff] }
   0x9   :  { %v112_v32 = vmul.f32 %v258_v5, %v89_v22  ;;  %v127_v40 = vadd.f32 %v111_v20, %v72_v31  ;;  %v114_v43 = vmul.f32 %v258_v5, %v91_v30  ;;  %v129_v50 = vadd.f32 %v113_v34, %v74_v41  ;;  %v31_v53 = vld [vmem:[%s466_s0 + $0x40] sm:$0xff]  ;;  %v34_v11 = vld [vmem:[%s466_s0 + $0x58] sm:$0xff]  ;;  %v36_v23 = vld [vmem:[%s466_s0 + $0x68] sm:$0xff] }
   0xa   :  { %v147_v35 = vadd.f32 %v264_v7, %v124_v24  ;;  %v73_v38 = vadd.f32 %v249_v2, %v50_v27  ;;  %v148_v46 = vadd.f32 %v264_v7, %v125_v36  ;;  %v149_v47 = vadd.f32 %v264_v7, %v126_v37  ;;  %v93_v54 = vld [vmem:[%s469_s3 + $0x40] sm:$0xff]  ;;  %v96_v12 = vld [vmem:[%s469_s3 + $0x58] sm:$0xff]  ;;  %v37_v33 = vld [vmem:[%s466_s0 + $0x70] sm:$0xff] }
   0xb   :  { %v150_v49 = vadd.f32 %v264_v7, %v127_v40  ;;  %v75_v51 = vadd.f32 %v249_v2, %v52_v42  ;;  %v53_v52 = vmul.f32 %v244_v1, %v30_v39  ;;  %v115_v59 = vmul.f32 %v258_v5, %v92_v44  ;;  %v35_v17 = vld [vmem:[%s466_s0 + $0x60] sm:$0xff]  ;;  %v99_v42 = vld [vmem:[%s469_s3 + $0x70] sm:$0xff] }
   0xc   :  { %v163_v45 = vmax.f32 %v147_v35, 0.0  ;;  %v128_v48 = vadd.f32 %v112_v32, %v73_v38  ;;  %v164_v56 = vmax.f32 %v148_v46, 0.0  ;;  %v165_v57 = vmax.f32 %v149_v47, 0.0  ;;  %v97_v22 = vld [vmem:[%s469_s3 + $0x60] sm:$0xff]  ;;  %v98_v32 = vld [vmem:[%s469_s3 + $0x68] sm:$0xff]  ;;  %v38_v47 = vld [vmem:[%s466_s0 + $0x78] sm:$0xff] }
   0xd   :  { %v166_v61 = vmax.f32 %v150_v49, 0.0  ;;  %v152_v62 = vadd.f32 %v264_v7, %v129_v50  ;;  %v130_v63 = vadd.f32 %v114_v43, %v75_v51  ;;  %v76_v0 = vadd.f32 %v249_v2, %v53_v52 }
   0xe   :  { %179 = vst [vmem:[%s472_s6] sm:$0xff] %v163_v45  ;;  %v151_v58 = vadd.f32 %v264_v7, %v128_v48  ;;  %180 = vst [vmem:[%s472_s6 + $0x8] sm:$0xff] %v164_v56  ;;  %v54_v8 = vmul.f32 %v244_v1, %v31_v53  ;;  %v116_v9 = vmul.f32 %v258_v5, %v93_v54  ;;  %v100_v48 = vld [vmem:[%s469_s3 + $0x78] sm:$0xff] }
   0xf   :  { %181 = vst [vmem:[%s472_s6 + $0x10] sm:$0xff] %v165_v57  ;;  %v55_v10 = vmul.f32 %v244_v1, %v32_v55  ;;  %182 = vst [vmem:[%s472_s6 + $0x18] sm:$0xff] %v166_v61  ;;  %v168_v13 = vmax.f32 %v152_v62, 0.0  ;;  %v153_v14 = vadd.f32 %v264_v7, %v130_v63  ;;  %v131_v15 = vadd.f32 %v115_v59, %v76_v0 }
  0x10   :  { %v167_v6 = vmax.f32 %v151_v58, 0.0  ;;  %v117_v16 = vmul.f32 %v258_v5, %v94_v60  ;;  %v77_v18 = vadd.f32 %v249_v2, %v54_v8  ;;  %v56_v20 = vmul.f32 %v244_v1, %v33_v3 }
  0x11   :  { %v78_v19 = vadd.f32 %v249_v2, %v55_v10  ;;  %v118_v21 = vmul.f32 %v258_v5, %v95_v4  ;;  %184 = vst [vmem:[%s472_s6 + $0x28] sm:$0xff] %v168_v13  ;;  %v169_v24 = vmax.f32 %v153_v14, 0.0  ;;  %v154_v25 = vadd.f32 %v264_v7, %v131_v15 }
  0x12   :  { %183 = vst [vmem:[%s472_s6 + $0x20] sm:$0xff] %v167_v6  ;;  %v57_v26 = vmul.f32 %v244_v1, %v34_v11  ;;  %v119_v27 = vmul.f32 %v258_v5, %v96_v12  ;;  %v132_v28 = vadd.f32 %v116_v9, %v77_v18  ;;  %v79_v30 = vadd.f32 %v249_v2, %v56_v20 }
  0x13   :  { %v133_v29 = vadd.f32 %v117_v16, %v78_v19  ;;  %v58_v31 = vmul.f32 %v244_v1, %v35_v17  ;;  %185 = vst [vmem:[%s472_s6 + $0x30] sm:$0xff] %v169_v24  ;;  %v170_v34 = vmax.f32 %v154_v25, 0.0  ;;  %v120_v36 = vmul.f32 %v258_v5, %v97_v22 }
  0x14   :  { %v80_v35 = vadd.f32 %v249_v2, %v57_v26  ;;  %v59_v37 = vmul.f32 %v244_v1, %v36_v23  ;;  %v155_v38 = vadd.f32 %v264_v7, %v132_v28  ;;  %v134_v40 = vadd.f32 %v118_v21, %v79_v30 }
  0x15   :  { %v156_v39 = vadd.f32 %v264_v7, %v133_v29  ;;  %v81_v41 = vadd.f32 %v249_v2, %v58_v31  ;;  %186 = vst [vmem:[%s472_s6 + $0x38] sm:$0xff] %v170_v34  ;;  %v121_v45 = vmul.f32 %v258_v5, %v98_v32  ;;  %v60_v46 = vmul.f32 %v244_v1, %v37_v33 }
  0x16   :  { %v135_v43 = vadd.f32 %v119_v27, %v80_v35  ;;  %v82_v44 = vadd.f32 %v249_v2, %v59_v37  ;;  %v171_v49 = vmax.f32 %v155_v38, 0.0  ;;  %v157_v51 = vadd.f32 %v264_v7, %v134_v40 }
  0x17   :  { %v172_v50 = vmax.f32 %v156_v39, 0.0  ;;  %v136_v52 = vadd.f32 %v120_v36, %v81_v41  ;;  %v83_v55 = vadd.f32 %v249_v2, %v60_v46  ;;  %v122_v56 = vmul.f32 %v258_v5, %v99_v42 }
  0x18   :  { %v158_v53 = vadd.f32 %v264_v7, %v135_v43  ;;  %v137_v54 = vadd.f32 %v121_v45, %v82_v44  ;;  %187 = vst [vmem:[%s472_s6 + $0x40] sm:$0xff] %v171_v49  ;;  %v173_v57 = vmax.f32 %v157_v51, 0.0  ;;  %v61_v59 = vmul.f32 %v244_v1, %v38_v47 }
  0x19   :  { %188 = vst [vmem:[%s472_s6 + $0x48] sm:$0xff] %v172_v50  ;;  %v159_v58 = vadd.f32 %v264_v7, %v136_v52  ;;  %v123_v60 = vmul.f32 %v258_v5, %v100_v48  ;;  %v138_v63 = vadd.f32 %v122_v56, %v83_v55 }
  0x1a   :  { %v174_v61 = vmax.f32 %v158_v53, 0.0  ;;  %v160_v62 = vadd.f32 %v264_v7, %v137_v54  ;;  %189 = vst [vmem:[%s472_s6 + $0x50] sm:$0xff] %v173_v57  ;;  %v84_v3 = vadd.f32 %v249_v2, %v61_v59 }
  0x1b   :  { %v175_v0 = vmax.f32 %v159_v58, 0.0  ;;  %v161_v1 = vadd.f32 %v264_v7, %v138_v63 }
  0x1c   :  { %190 = vst [vmem:[%s472_s6 + $0x58] sm:$0xff] %v174_v61  ;;  %v176_v4 = vmax.f32 %v160_v62, 0.0  ;;  %v139_v5 = vadd.f32 %v123_v60, %v84_v3 }
  0x1d   :  { %191 = vst [vmem:[%s472_s6 + $0x60] sm:$0xff] %v175_v0  ;;  %v177_v6 = vmax.f32 %v161_v1, 0.0 }
  0x1e   :  { %192 = vst [vmem:[%s472_s6 + $0x68] sm:$0xff] %v176_v4  ;;  %v162_v8 = vadd.f32 %v264_v7, %v139_v5 }
  0x1f   :  { %193 = vst [vmem:[%s472_s6 + $0x70] sm:$0xff] %v177_v6 }
  0x20   :  { %v178_v2 = vmax.f32 %v162_v8, 0.0 }
  0x22   :  { %194 = vst [vmem:[%s472_s6 + $0x78] sm:$0xff] %v178_v2 }

</bundles_post_ra>
